<compile_context>
chip_gen: v5e
topology: v5e:2x2
jax: 0.10.0
libtpu: 0.0.40
codegen_flags: <defaults>
</compile_context>

<pallas_src>
import functools

import jax
import jax.numpy as jnp
from jax.experimental import pallas as pl
from jax.experimental.pallas import tpu as pltpu

NUM_INVARIANTS = 6    # (n,m): (0,0),(1,1),(2,0),(2,2),(3,1),(3,3)
NUM_MOMENTS = 10      # geometric moments up to total order 3
MOM_PAD = 16          # sublane-padded moment rows (bf16 sublane tile)
C_PAD = 128           # lane-padded per-invariant channel width (96 -> 128)
OUT_PAD = 128         # lane-padded linear output width (10 -> 128)


# ----------------------------------------------------------------------------
# Fused kernel: moments (1 MXU dot) -> invariants (VPU/EUP, all (B, Cp)) ->
#               BN (batch stats) -> fused Linear (1 MXU dot).
# ----------------------------------------------------------------------------
def _fused_kernel(use_com, x_ref, basis_ref, gamma_ref, beta_ref, w_ref,
                  bias_ref, out_ref):
    bsz = out_ref.shape[0]
    cp = gamma_ref.shape[1]

    # --- raw geometric moments for the WHOLE batch in one MXU matmul --------
    # basis: (MOM_PAD, P) bf16 (disk mask, monomials, 1/npix folded in)
    # x    : (P, B*Cp)    bf16           -> mom: (MOM_PAD, B*Cp) f32
    mom = jnp.dot(basis_ref[...], x_ref[...],
                  preferred_element_type=jnp.float32)
    mom = mom.reshape(MOM_PAD, bsz, cp)       # single lane->sublane retile
    m00, m10, m01 = mom[0], mom[1], mom[2]
    m20, m11, m02 = mom[3], mom[4], mom[5]
    m30, m21, m12, m03 = mom[6], mom[7], mom[8], mom[9]

    if use_com:
        # Centroid shift via binomial translation of the raw moments.
        # TODO(synk): exact h-next COM guard unknown; 1/(m00+1e-6) kept, exact
        #             divide (not approx) per correctness review.
        inv_mass = 1.0 / (m00 + 1e-6)
        a = -(m10 * inv_mass)                 # a = -cx
        c = -(m01 * inv_mass)                 # c = -cy
        a2, c2, ac = a * a, c * c, a * c
        mu10 = m10 + a * m00
        mu01 = m01 + c * m00
        mu20 = m20 + 2.0 * a * m10 + a2 * m00
        mu11 = m11 + a * m01 + c * m10 + ac * m00
        mu02 = m02 + 2.0 * c * m01 + c2 * m00
        mu30 = m30 + 3.0 * a * m20 + 3.0 * a2 * m10 + a2 * a * m00
        mu21 = (m21 + c * m20 + 2.0 * a * m11 + 2.0 * ac * m10
                + a2 * m01 + a2 * c * m00)
        mu12 = (m12 + a * m02 + 2.0 * c * m11 + 2.0 * ac * m01
                + c2 * m10 + a * c2 * m00)
        mu03 = m03 + 3.0 * c * m02 + 3.0 * c2 * m01 + c2 * c * m00
    else:
        mu10, mu01 = m10, m01
        mu20, mu11, mu02 = m20, m11, m02
        mu30, mu21, mu12, mu03 = m30, m21, m12, m03

    def cmag(re, im):
        return jnp.sqrt(re * re + im * im)

    # Zernike rotation-invariant magnitudes, each (B, Cp), mean-pool scale
    # already folded into the basis (all invariants are degree-1 in moments).
    zs = [
        jnp.abs(m00),                                         # Z(0,0)
        cmag(mu10, mu01),                                     # Z(1,1)
        jnp.abs(2.0 * (mu20 + mu02) - m00),                   # Z(2,0)
        cmag(mu20 - mu02, 2.0 * mu11),                        # Z(2,2)
        cmag(3.0 * (mu30 + mu12) - 2.0 * mu10,
             3.0 * (mu03 + mu21) - 2.0 * mu01),               # Z(3,1)
        cmag(mu30 - 3.0 * mu12, 3.0 * mu21 - mu03),           # Z(3,3)
    ]

    # --- BatchNorm1d (training-mode batch stats, biased var), per block -----
    gamma = gamma_ref[...]                    # (NUM_INVARIANTS, Cp)
    beta = beta_ref[...]
    inv_b = 1.0 / float(bsz)
    feats = []
    for k in range(NUM_INVARIANTS):
        zk = zs[k]                                            # (B, Cp)
        mean = jnp.sum(zk, axis=0, keepdims=True) * inv_b
        diff = zk - mean
        var = jnp.sum(diff * diff, axis=0, keepdims=True) * inv_b
        scale = gamma[k:k + 1, :] * jax.lax.rsqrt(var + 1e-5)
        feats.append(diff * scale + beta[k:k + 1, :])         # single FMA

    # --- single fused Linear over the lane-contiguous (B, 6*Cp) slab --------
    feat = jnp.concatenate(feats, axis=1)                     # (B, 6*Cp)
    out = jnp.dot(feat.astype(jnp.bfloat16), w_ref[...],
                  preferred_element_type=jnp.float32)         # (B, OUT_PAD)
    out_ref[...] = out + bias_ref[...]


# ----------------------------------------------------------------------------
# Module forward (wrapper does only tiny pad / transpose / final slice).
# ----------------------------------------------------------------------------
def zernike_rank_pooling_forward(x, params, *, max_rank=2, channels_per_rank=32,
                                 input_size=16, use_center_of_mass=True,
                                 num_classes=10):
    b, h, w, c = x.shape
    r1 = max_rank + 1
    assert c == r1 * channels_per_rank and h == input_size and w == input_size
    p = h * w
    cp = C_PAD

    # 'b h w (r c)' -> '(h w) b c_pad' -> (P, B*Cp): ~0.25 MiB one-time
    # relayout so the kernel issues ONE batch-wide moment matmul with a full
    # MXU N dimension; bf16 halves the only non-trivial HBM->VMEM DMA.
    x_flat = x.reshape(b, p, c)
    x_pad = jnp.pad(x_flat, ((0, 0), (0, 0), (0, cp - c)))
    x_slab = jnp.transpose(x_pad, (1, 0, 2)).reshape(p, b * cp)
    x_slab = x_slab.astype(jnp.bfloat16)

    kernel = functools.partial(_fused_kernel, use_center_of_mass)

    flops = (2 * MOM_PAD * p * (b * cp)
             + 2 * b * (NUM_INVARIANTS * cp) * OUT_PAD)
    transcendentals = 6 * b * cp + NUM_INVARIANTS * cp
    bytes_accessed = (p * b * cp * 2                       # x slab (bf16)
                      + MOM_PAD * p * 2                    # basis (bf16)
                      + 2 * NUM_INVARIANTS * cp * 4        # gamma, beta
                      + NUM_INVARIANTS * cp * OUT_PAD * 2  # W (bf16)
                      + OUT_PAD * 4 + b * OUT_PAD * 4)     # bias, out

    out_pad = pl.pallas_call(
        kernel,
        out_shape=jax.ShapeDtypeStruct((b, OUT_PAD), jnp.float32),
        grid=(1,),
        in_specs=[
            pl.BlockSpec((p, b * cp), lambda i: (0, 0)),                  # x
            pl.BlockSpec((MOM_PAD, p), lambda i: (0, 0)),                 # basis
            pl.BlockSpec((NUM_INVARIANTS, cp), lambda i: (0, 0)),         # gamma
            pl.BlockSpec((NUM_INVARIANTS, cp), lambda i: (0, 0)),         # beta
            pl.BlockSpec((NUM_INVARIANTS * cp, OUT_PAD), lambda i: (0, 0)),  # W
            pl.BlockSpec((1, OUT_PAD), lambda i: (0, 0)),                 # bias
        ],
        out_specs=pl.BlockSpec((b, OUT_PAD), lambda i: (0, 0)),
        compiler_params=pltpu.CompilerParams(
            dimension_semantics=("arbitrary",)),
        cost_estimate=pl.CostEstimate(flops=flops,
                                      transcendentals=transcendentals,
                                      bytes_accessed=bytes_accessed),
    )(x_slab, params["basis"], params["gamma"], params["beta"],
      params["w"], params["b"])
    return out_pad[:, :num_classes]


# ----------------------------------------------------------------------------
# Host-side parameter construction.
# ----------------------------------------------------------------------------
def make_zernike_basis(size, mom_pad=MOM_PAD):
    """(mom_pad, size*size) bf16 masked monomials, mean-pool 1/npix folded in."""
    coord = (2.0 * jnp.arange(size, dtype=jnp.float32) + 1.0 - size) / size
    yy, xx = jnp.meshgrid(coord, coord, indexing="ij")
    mask = ((xx * xx + yy * yy) <= 1.0).astype(jnp.float32)
    m = (mask / jnp.sum(mask)).reshape(-1)            # disk mask * 1/npix
    x = xx.reshape(-1)
    y = yy.reshape(-1)
    monos = [jnp.ones_like(x), x, y,
             x * x, x * y, y * y,
             x * x * x, x * x * y, x * y * y, y * y * y]
    basis = jnp.stack([m * t for t in monos], axis=0)                  # (10, P)
    pad = jnp.zeros((mom_pad - len(monos), size * size), jnp.float32)
    return jnp.concatenate([basis, pad], axis=0).astype(jnp.bfloat16)  # (16, P)


def make_params(key, *, max_rank, channels_per_rank, input_size, num_classes=10):
    c = (max_rank + 1) * channels_per_rank
    cp = C_PAD
    feat = NUM_INVARIANTS * c
    kw, kb = jax.random.split(key, 2)

    gamma = (1.0 + 0.01 * jnp.arange(feat, dtype=jnp.float32) / feat
             ).reshape(NUM_INVARIANTS, c)
    beta = (0.001 * jnp.arange(feat, dtype=jnp.float32)
            ).reshape(NUM_INVARIANTS, c)
    gamma = jnp.pad(gamma, ((0, 0), (0, cp - c)))          # padded chans -> 0
    beta = jnp.pad(beta, ((0, 0), (0, cp - c)))

    w = 0.05 * jax.random.normal(kw, (NUM_INVARIANTS, c, num_classes),
                                 jnp.float32)
    w = jnp.pad(w, ((0, 0), (0, cp - c), (0, OUT_PAD - num_classes)))
    w = w.reshape(NUM_INVARIANTS * cp, OUT_PAD).astype(jnp.bfloat16)   # (768,128)

    bias = 0.01 * jax.random.normal(kb, (1, num_classes), jnp.float32)
    bias = jnp.pad(bias, ((0, 0), (0, OUT_PAD - num_classes)))

    return {"basis": make_zernike_basis(input_size),
            "gamma": gamma, "beta": beta, "w": w, "b": bias}


if __name__ == "__main__":
    max_rank, cpr, size = 2, 32, 16
    key = jax.random.PRNGKey(0)
    kx, kp = jax.random.split(key)
    x = jax.random.normal(kx, (2, size, size, (max_rank + 1) * cpr), jnp.float32)
    params = make_params(kp, max_rank=max_rank, channels_per_rank=cpr,
                         input_size=size)

    fwd = jax.jit(functools.partial(
        zernike_rank_pooling_forward,
        max_rank=max_rank, channels_per_rank=cpr,
        input_size=size, use_center_of_mass=True))
    out = jax.block_until_ready(fwd(x, params))

    assert out.shape == (2, 10), out.shape
    assert bool(jnp.all(jnp.isfinite(out)))
    print("KERNEL_OK")
</pallas_src>

<mosaic_0001>
module attributes {stable_mosaic.version = 11 : i64} {
  func.func @_fused_kernel(%arg0: i32, %arg1: memref<256x256xbf16, #tpu.memory_space<vmem>>, %arg2: memref<16x256xbf16, #tpu.memory_space<vmem>>, %arg3: memref<6x128xf32, #tpu.memory_space<vmem>>, %arg4: memref<6x128xf32, #tpu.memory_space<vmem>>, %arg5: memref<768x128xbf16, #tpu.memory_space<vmem>>, %arg6: memref<1x128xf32, #tpu.memory_space<vmem>>, %arg7: memref<2x128xf32, #tpu.memory_space<vmem>>) attributes {dimension_semantics = [#tpu.dimension_semantics<arbitrary>], iteration_bounds = array<i64: 1>, scalar_prefetch = 0 : i64, scratch_operands = 0 : i64, tpu.core_type = #tpu.core_type<tc>, window_params = [{pipeline_mode = #tpu.pipeline_mode<synchronous>, transform_indices = @transform_0, window_bounds = array<i64: 256, 256>}, {pipeline_mode = #tpu.pipeline_mode<synchronous>, transform_indices = @transform_1, window_bounds = array<i64: 16, 256>}, {pipeline_mode = #tpu.pipeline_mode<synchronous>, transform_indices = @transform_2, window_bounds = array<i64: 6, 128>}, {pipeline_mode = #tpu.pipeline_mode<synchronous>, transform_indices = @transform_3, window_bounds = array<i64: 6, 128>}, {pipeline_mode = #tpu.pipeline_mode<synchronous>, transform_indices = @transform_4, window_bounds = array<i64: 768, 128>}, {pipeline_mode = #tpu.pipeline_mode<synchronous>, transform_indices = @transform_5, window_bounds = array<i64: 1, 128>}, {pipeline_mode = #tpu.pipeline_mode<synchronous>, transform_indices = @transform_6, window_bounds = array<i64: 2, 128>}]} {
    %c0 = arith.constant 0 : index
    %c0_0 = arith.constant 0 : index
    %0 = vector.load %arg2[%c0, %c0_0] : memref<16x256xbf16, #tpu.memory_space<vmem>>, vector<16x256xbf16>
    %c0_1 = arith.constant 0 : index
    %c0_2 = arith.constant 0 : index
    %1 = vector.load %arg1[%c0_1, %c0_2] : memref<256x256xbf16, #tpu.memory_space<vmem>>, vector<256x256xbf16>
    %cst = arith.constant dense<0.000000e+00> : vector<16x256xf32>
    %2 = tpu.matmul %0, %1, %cst {dimension_numbers = #tpu.dot_dimension_numbers<[1], [0], [0], [1], [0, 0, 1, 1], [], []>} : vector<16x256xbf16>, vector<256x256xbf16>, vector<16x256xf32> -> vector<16x256xf32>
    %3 = vector.shape_cast %2 : vector<16x256xf32> to vector<16x2x128xf32>
    %4 = vector.extract_strided_slice %3 {offsets = [0, 0, 0], sizes = [1, 2, 128], strides = [1, 1, 1]} : vector<16x2x128xf32> to vector<1x2x128xf32>
    %5 = vector.shape_cast %4 : vector<1x2x128xf32> to vector<2x128xf32>
    %6 = vector.extract_strided_slice %3 {offsets = [1, 0, 0], sizes = [1, 2, 128], strides = [1, 1, 1]} : vector<16x2x128xf32> to vector<1x2x128xf32>
    %7 = vector.shape_cast %6 : vector<1x2x128xf32> to vector<2x128xf32>
    %8 = vector.extract_strided_slice %3 {offsets = [2, 0, 0], sizes = [1, 2, 128], strides = [1, 1, 1]} : vector<16x2x128xf32> to vector<1x2x128xf32>
    %9 = vector.shape_cast %8 : vector<1x2x128xf32> to vector<2x128xf32>
    %10 = vector.extract_strided_slice %3 {offsets = [3, 0, 0], sizes = [1, 2, 128], strides = [1, 1, 1]} : vector<16x2x128xf32> to vector<1x2x128xf32>
    %11 = vector.shape_cast %10 : vector<1x2x128xf32> to vector<2x128xf32>
    %12 = vector.extract_strided_slice %3 {offsets = [4, 0, 0], sizes = [1, 2, 128], strides = [1, 1, 1]} : vector<16x2x128xf32> to vector<1x2x128xf32>
    %13 = vector.shape_cast %12 : vector<1x2x128xf32> to vector<2x128xf32>
    %14 = vector.extract_strided_slice %3 {offsets = [5, 0, 0], sizes = [1, 2, 128], strides = [1, 1, 1]} : vector<16x2x128xf32> to vector<1x2x128xf32>
    %15 = vector.shape_cast %14 : vector<1x2x128xf32> to vector<2x128xf32>
    %16 = vector.extract_strided_slice %3 {offsets = [6, 0, 0], sizes = [1, 2, 128], strides = [1, 1, 1]} : vector<16x2x128xf32> to vector<1x2x128xf32>
    %17 = vector.shape_cast %16 : vector<1x2x128xf32> to vector<2x128xf32>
    %18 = vector.extract_strided_slice %3 {offsets = [7, 0, 0], sizes = [1, 2, 128], strides = [1, 1, 1]} : vector<16x2x128xf32> to vector<1x2x128xf32>
    %19 = vector.shape_cast %18 : vector<1x2x128xf32> to vector<2x128xf32>
    %20 = vector.extract_strided_slice %3 {offsets = [8, 0, 0], sizes = [1, 2, 128], strides = [1, 1, 1]} : vector<16x2x128xf32> to vector<1x2x128xf32>
    %21 = vector.shape_cast %20 : vector<1x2x128xf32> to vector<2x128xf32>
    %22 = vector.extract_strided_slice %3 {offsets = [9, 0, 0], sizes = [1, 2, 128], strides = [1, 1, 1]} : vector<16x2x128xf32> to vector<1x2x128xf32>
    %23 = vector.shape_cast %22 : vector<1x2x128xf32> to vector<2x128xf32>
    %cst_3 = arith.constant 9.99999997E-7 : f32
    %24 = vector.broadcast %cst_3 : f32 to vector<2x128xf32>
    %25 = arith.addf %5, %24 : vector<2x128xf32>
    %cst_4 = arith.constant 1.000000e+00 : f32
    %26 = vector.broadcast %cst_4 : f32 to vector<2x128xf32>
    %27 = arith.divf %26, %25 : vector<2x128xf32>
    %28 = arith.mulf %7, %27 : vector<2x128xf32>
    %cst_5 = arith.constant 0.000000e+00 : f32
    %29 = vector.broadcast %cst_5 : f32 to vector<2x128xf32>
    %30 = arith.subf %29, %28 : vector<2x128xf32>
    %31 = arith.mulf %9, %27 : vector<2x128xf32>
    %cst_6 = arith.constant 0.000000e+00 : f32
    %32 = vector.broadcast %cst_6 : f32 to vector<2x128xf32>
    %33 = arith.subf %32, %31 : vector<2x128xf32>
    %34 = arith.mulf %30, %30 : vector<2x128xf32>
    %35 = arith.mulf %33, %33 : vector<2x128xf32>
    %36 = arith.mulf %30, %33 : vector<2x128xf32>
    %37 = arith.mulf %30, %5 : vector<2x128xf32>
    %38 = arith.addf %7, %37 : vector<2x128xf32>
    %39 = arith.mulf %33, %5 : vector<2x128xf32>
    %40 = arith.addf %9, %39 : vector<2x128xf32>
    %cst_7 = arith.constant 2.000000e+00 : f32
    %41 = vector.broadcast %cst_7 : f32 to vector<2x128xf32>
    %42 = arith.mulf %41, %30 : vector<2x128xf32>
    %43 = arith.mulf %42, %7 : vector<2x128xf32>
    %44 = arith.addf %11, %43 : vector<2x128xf32>
    %45 = arith.mulf %34, %5 : vector<2x128xf32>
    %46 = arith.addf %44, %45 : vector<2x128xf32>
    %47 = arith.mulf %30, %9 : vector<2x128xf32>
    %48 = arith.addf %13, %47 : vector<2x128xf32>
    %49 = arith.mulf %33, %7 : vector<2x128xf32>
    %50 = arith.addf %48, %49 : vector<2x128xf32>
    %51 = arith.mulf %36, %5 : vector<2x128xf32>
    %52 = arith.addf %50, %51 : vector<2x128xf32>
    %cst_8 = arith.constant 2.000000e+00 : f32
    %53 = vector.broadcast %cst_8 : f32 to vector<2x128xf32>
    %54 = arith.mulf %53, %33 : vector<2x128xf32>
    %55 = arith.mulf %54, %9 : vector<2x128xf32>
    %56 = arith.addf %15, %55 : vector<2x128xf32>
    %57 = arith.mulf %35, %5 : vector<2x128xf32>
    %58 = arith.addf %56, %57 : vector<2x128xf32>
    %cst_9 = arith.constant 3.000000e+00 : f32
    %59 = vector.broadcast %cst_9 : f32 to vector<2x128xf32>
    %60 = arith.mulf %59, %30 : vector<2x128xf32>
    %61 = arith.mulf %60, %11 : vector<2x128xf32>
    %62 = arith.addf %17, %61 : vector<2x128xf32>
    %cst_10 = arith.constant 3.000000e+00 : f32
    %63 = vector.broadcast %cst_10 : f32 to vector<2x128xf32>
    %64 = arith.mulf %63, %34 : vector<2x128xf32>
    %65 = arith.mulf %64, %7 : vector<2x128xf32>
    %66 = arith.addf %62, %65 : vector<2x128xf32>
    %67 = arith.mulf %34, %30 : vector<2x128xf32>
    %68 = arith.mulf %67, %5 : vector<2x128xf32>
    %69 = arith.addf %66, %68 : vector<2x128xf32>
    %70 = arith.mulf %33, %11 : vector<2x128xf32>
    %71 = arith.addf %19, %70 : vector<2x128xf32>
    %cst_11 = arith.constant 2.000000e+00 : f32
    %72 = vector.broadcast %cst_11 : f32 to vector<2x128xf32>
    %73 = arith.mulf %72, %30 : vector<2x128xf32>
    %74 = arith.mulf %73, %13 : vector<2x128xf32>
    %75 = arith.addf %71, %74 : vector<2x128xf32>
    %cst_12 = arith.constant 2.000000e+00 : f32
    %76 = vector.broadcast %cst_12 : f32 to vector<2x128xf32>
    %77 = arith.mulf %76, %36 : vector<2x128xf32>
    %78 = arith.mulf %77, %7 : vector<2x128xf32>
    %79 = arith.addf %75, %78 : vector<2x128xf32>
    %80 = arith.mulf %34, %9 : vector<2x128xf32>
    %81 = arith.addf %79, %80 : vector<2x128xf32>
    %82 = arith.mulf %34, %33 : vector<2x128xf32>
    %83 = arith.mulf %82, %5 : vector<2x128xf32>
    %84 = arith.addf %81, %83 : vector<2x128xf32>
    %85 = arith.mulf %30, %15 : vector<2x128xf32>
    %86 = arith.addf %21, %85 : vector<2x128xf32>
    %cst_13 = arith.constant 2.000000e+00 : f32
    %87 = vector.broadcast %cst_13 : f32 to vector<2x128xf32>
    %88 = arith.mulf %87, %33 : vector<2x128xf32>
    %89 = arith.mulf %88, %13 : vector<2x128xf32>
    %90 = arith.addf %86, %89 : vector<2x128xf32>
    %cst_14 = arith.constant 2.000000e+00 : f32
    %91 = vector.broadcast %cst_14 : f32 to vector<2x128xf32>
    %92 = arith.mulf %91, %36 : vector<2x128xf32>
    %93 = arith.mulf %92, %9 : vector<2x128xf32>
    %94 = arith.addf %90, %93 : vector<2x128xf32>
    %95 = arith.mulf %35, %7 : vector<2x128xf32>
    %96 = arith.addf %94, %95 : vector<2x128xf32>
    %97 = arith.mulf %30, %35 : vector<2x128xf32>
    %98 = arith.mulf %97, %5 : vector<2x128xf32>
    %99 = arith.addf %96, %98 : vector<2x128xf32>
    %cst_15 = arith.constant 3.000000e+00 : f32
    %100 = vector.broadcast %cst_15 : f32 to vector<2x128xf32>
    %101 = arith.mulf %100, %33 : vector<2x128xf32>
    %102 = arith.mulf %101, %15 : vector<2x128xf32>
    %103 = arith.addf %23, %102 : vector<2x128xf32>
    %cst_16 = arith.constant 3.000000e+00 : f32
    %104 = vector.broadcast %cst_16 : f32 to vector<2x128xf32>
    %105 = arith.mulf %104, %35 : vector<2x128xf32>
    %106 = arith.mulf %105, %9 : vector<2x128xf32>
    %107 = arith.addf %103, %106 : vector<2x128xf32>
    %108 = arith.mulf %35, %33 : vector<2x128xf32>
    %109 = arith.mulf %108, %5 : vector<2x128xf32>
    %110 = arith.addf %107, %109 : vector<2x128xf32>
    %111 = math.absf %5 : vector<2x128xf32>
    %112 = arith.mulf %38, %38 : vector<2x128xf32>
    %113 = arith.mulf %40, %40 : vector<2x128xf32>
    %114 = arith.addf %112, %113 : vector<2x128xf32>
    %115 = math.sqrt %114 : vector<2x128xf32>
    %116 = arith.addf %46, %58 : vector<2x128xf32>
    %cst_17 = arith.constant 2.000000e+00 : f32
    %117 = vector.broadcast %cst_17 : f32 to vector<2x128xf32>
    %118 = arith.mulf %117, %116 : vector<2x128xf32>
    %119 = arith.subf %118, %5 : vector<2x128xf32>
    %120 = math.absf %119 : vector<2x128xf32>
    %121 = arith.subf %46, %58 : vector<2x128xf32>
    %cst_18 = arith.constant 2.000000e+00 : f32
    %122 = vector.broadcast %cst_18 : f32 to vector<2x128xf32>
    %123 = arith.mulf %122, %52 : vector<2x128xf32>
    %124 = arith.mulf %121, %121 : vector<2x128xf32>
    %125 = arith.mulf %123, %123 : vector<2x128xf32>
    %126 = arith.addf %124, %125 : vector<2x128xf32>
    %127 = math.sqrt %126 : vector<2x128xf32>
    %128 = arith.addf %69, %99 : vector<2x128xf32>
    %cst_19 = arith.constant 3.000000e+00 : f32
    %129 = vector.broadcast %cst_19 : f32 to vector<2x128xf32>
    %130 = arith.mulf %129, %128 : vector<2x128xf32>
    %cst_20 = arith.constant 2.000000e+00 : f32
    %131 = vector.broadcast %cst_20 : f32 to vector<2x128xf32>
    %132 = arith.mulf %131, %38 : vector<2x128xf32>
    %133 = arith.subf %130, %132 : vector<2x128xf32>
    %134 = arith.addf %110, %84 : vector<2x128xf32>
    %cst_21 = arith.constant 3.000000e+00 : f32
    %135 = vector.broadcast %cst_21 : f32 to vector<2x128xf32>
    %136 = arith.mulf %135, %134 : vector<2x128xf32>
    %cst_22 = arith.constant 2.000000e+00 : f32
    %137 = vector.broadcast %cst_22 : f32 to vector<2x128xf32>
    %138 = arith.mulf %137, %40 : vector<2x128xf32>
    %139 = arith.subf %136, %138 : vector<2x128xf32>
    %140 = arith.mulf %133, %133 : vector<2x128xf32>
    %141 = arith.mulf %139, %139 : vector<2x128xf32>
    %142 = arith.addf %140, %141 : vector<2x128xf32>
    %143 = math.sqrt %142 : vector<2x128xf32>
    %cst_23 = arith.constant 3.000000e+00 : f32
    %144 = vector.broadcast %cst_23 : f32 to vector<2x128xf32>
    %145 = arith.mulf %144, %99 : vector<2x128xf32>
    %146 = arith.subf %69, %145 : vector<2x128xf32>
    %cst_24 = arith.constant 3.000000e+00 : f32
    %147 = vector.broadcast %cst_24 : f32 to vector<2x128xf32>
    %148 = arith.mulf %147, %84 : vector<2x128xf32>
    %149 = arith.subf %148, %110 : vector<2x128xf32>
    %150 = arith.mulf %146, %146 : vector<2x128xf32>
    %151 = arith.mulf %149, %149 : vector<2x128xf32>
    %152 = arith.addf %150, %151 : vector<2x128xf32>
    %153 = math.sqrt %152 : vector<2x128xf32>
    %c0_25 = arith.constant 0 : index
    %c0_26 = arith.constant 0 : index
    %154 = vector.load %arg3[%c0_25, %c0_26] : memref<6x128xf32, #tpu.memory_space<vmem>>, vector<6x128xf32>
    %c0_27 = arith.constant 0 : index
    %c0_28 = arith.constant 0 : index
    %155 = vector.load %arg4[%c0_27, %c0_28] : memref<6x128xf32, #tpu.memory_space<vmem>>, vector<6x128xf32>
    %cst_29 = arith.constant dense<0.000000e+00> : vector<128xf32>
    %156 = vector.multi_reduction <add>, %111, %cst_29 [0] : vector<2x128xf32> to vector<128xf32>
    %157 = vector.shape_cast %156 : vector<128xf32> to vector<1x128xf32>
    %cst_30 = arith.constant 5.000000e-01 : f32
    %158 = vector.broadcast %cst_30 : f32 to vector<1x128xf32>
    %159 = arith.mulf %157, %158 : vector<1x128xf32>
    %160 = vector.broadcast %159 : vector<1x128xf32> to vector<2x128xf32>
    %161 = arith.subf %111, %160 : vector<2x128xf32>
    %162 = arith.mulf %161, %161 : vector<2x128xf32>
    %cst_31 = arith.constant dense<0.000000e+00> : vector<128xf32>
    %163 = vector.multi_reduction <add>, %162, %cst_31 [0] : vector<2x128xf32> to vector<128xf32>
    %164 = vector.shape_cast %163 : vector<128xf32> to vector<1x128xf32>
    %cst_32 = arith.constant 5.000000e-01 : f32
    %165 = vector.broadcast %cst_32 : f32 to vector<1x128xf32>
    %166 = arith.mulf %164, %165 : vector<1x128xf32>
    %167 = vector.extract_strided_slice %154 {offsets = [0, 0], sizes = [1, 128], strides = [1, 1]} : vector<6x128xf32> to vector<1x128xf32>
    %cst_33 = arith.constant 9.99999974E-6 : f32
    %168 = vector.broadcast %cst_33 : f32 to vector<1x128xf32>
    %169 = arith.addf %166, %168 : vector<1x128xf32>
    %170 = math.rsqrt %169 : vector<1x128xf32>
    %171 = arith.mulf %167, %170 : vector<1x128xf32>
    %172 = vector.broadcast %171 : vector<1x128xf32> to vector<2x128xf32>
    %173 = arith.mulf %161, %172 : vector<2x128xf32>
    %174 = vector.extract_strided_slice %155 {offsets = [0, 0], sizes = [1, 128], strides = [1, 1]} : vector<6x128xf32> to vector<1x128xf32>
    %175 = vector.broadcast %174 : vector<1x128xf32> to vector<2x128xf32>
    %176 = arith.addf %173, %175 : vector<2x128xf32>
    %cst_34 = arith.constant dense<0.000000e+00> : vector<128xf32>
    %177 = vector.multi_reduction <add>, %115, %cst_34 [0] : vector<2x128xf32> to vector<128xf32>
    %178 = vector.shape_cast %177 : vector<128xf32> to vector<1x128xf32>
    %cst_35 = arith.constant 5.000000e-01 : f32
    %179 = vector.broadcast %cst_35 : f32 to vector<1x128xf32>
    %180 = arith.mulf %178, %179 : vector<1x128xf32>
    %181 = vector.broadcast %180 : vector<1x128xf32> to vector<2x128xf32>
    %182 = arith.subf %115, %181 : vector<2x128xf32>
    %183 = arith.mulf %182, %182 : vector<2x128xf32>
    %cst_36 = arith.constant dense<0.000000e+00> : vector<128xf32>
    %184 = vector.multi_reduction <add>, %183, %cst_36 [0] : vector<2x128xf32> to vector<128xf32>
    %185 = vector.shape_cast %184 : vector<128xf32> to vector<1x128xf32>
    %cst_37 = arith.constant 5.000000e-01 : f32
    %186 = vector.broadcast %cst_37 : f32 to vector<1x128xf32>
    %187 = arith.mulf %185, %186 : vector<1x128xf32>
    %188 = vector.extract_strided_slice %154 {offsets = [1, 0], sizes = [1, 128], strides = [1, 1]} : vector<6x128xf32> to vector<1x128xf32>
    %cst_38 = arith.constant 9.99999974E-6 : f32
    %189 = vector.broadcast %cst_38 : f32 to vector<1x128xf32>
    %190 = arith.addf %187, %189 : vector<1x128xf32>
    %191 = math.rsqrt %190 : vector<1x128xf32>
    %192 = arith.mulf %188, %191 : vector<1x128xf32>
    %193 = vector.broadcast %192 : vector<1x128xf32> to vector<2x128xf32>
    %194 = arith.mulf %182, %193 : vector<2x128xf32>
    %195 = vector.extract_strided_slice %155 {offsets = [1, 0], sizes = [1, 128], strides = [1, 1]} : vector<6x128xf32> to vector<1x128xf32>
    %196 = vector.broadcast %195 : vector<1x128xf32> to vector<2x128xf32>
    %197 = arith.addf %194, %196 : vector<2x128xf32>
    %cst_39 = arith.constant dense<0.000000e+00> : vector<128xf32>
    %198 = vector.multi_reduction <add>, %120, %cst_39 [0] : vector<2x128xf32> to vector<128xf32>
    %199 = vector.shape_cast %198 : vector<128xf32> to vector<1x128xf32>
    %cst_40 = arith.constant 5.000000e-01 : f32
    %200 = vector.broadcast %cst_40 : f32 to vector<1x128xf32>
    %201 = arith.mulf %199, %200 : vector<1x128xf32>
    %202 = vector.broadcast %201 : vector<1x128xf32> to vector<2x128xf32>
    %203 = arith.subf %120, %202 : vector<2x128xf32>
    %204 = arith.mulf %203, %203 : vector<2x128xf32>
    %cst_41 = arith.constant dense<0.000000e+00> : vector<128xf32>
    %205 = vector.multi_reduction <add>, %204, %cst_41 [0] : vector<2x128xf32> to vector<128xf32>
    %206 = vector.shape_cast %205 : vector<128xf32> to vector<1x128xf32>
    %cst_42 = arith.constant 5.000000e-01 : f32
    %207 = vector.broadcast %cst_42 : f32 to vector<1x128xf32>
    %208 = arith.mulf %206, %207 : vector<1x128xf32>
    %209 = vector.extract_strided_slice %154 {offsets = [2, 0], sizes = [1, 128], strides = [1, 1]} : vector<6x128xf32> to vector<1x128xf32>
    %cst_43 = arith.constant 9.99999974E-6 : f32
    %210 = vector.broadcast %cst_43 : f32 to vector<1x128xf32>
    %211 = arith.addf %208, %210 : vector<1x128xf32>
    %212 = math.rsqrt %211 : vector<1x128xf32>
    %213 = arith.mulf %209, %212 : vector<1x128xf32>
    %214 = vector.broadcast %213 : vector<1x128xf32> to vector<2x128xf32>
    %215 = arith.mulf %203, %214 : vector<2x128xf32>
    %216 = vector.extract_strided_slice %155 {offsets = [2, 0], sizes = [1, 128], strides = [1, 1]} : vector<6x128xf32> to vector<1x128xf32>
    %217 = vector.broadcast %216 : vector<1x128xf32> to vector<2x128xf32>
    %218 = arith.addf %215, %217 : vector<2x128xf32>
    %cst_44 = arith.constant dense<0.000000e+00> : vector<128xf32>
    %219 = vector.multi_reduction <add>, %127, %cst_44 [0] : vector<2x128xf32> to vector<128xf32>
    %220 = vector.shape_cast %219 : vector<128xf32> to vector<1x128xf32>
    %cst_45 = arith.constant 5.000000e-01 : f32
    %221 = vector.broadcast %cst_45 : f32 to vector<1x128xf32>
    %222 = arith.mulf %220, %221 : vector<1x128xf32>
    %223 = vector.broadcast %222 : vector<1x128xf32> to vector<2x128xf32>
    %224 = arith.subf %127, %223 : vector<2x128xf32>
    %225 = arith.mulf %224, %224 : vector<2x128xf32>
    %cst_46 = arith.constant dense<0.000000e+00> : vector<128xf32>
    %226 = vector.multi_reduction <add>, %225, %cst_46 [0] : vector<2x128xf32> to vector<128xf32>
    %227 = vector.shape_cast %226 : vector<128xf32> to vector<1x128xf32>
    %cst_47 = arith.constant 5.000000e-01 : f32
    %228 = vector.broadcast %cst_47 : f32 to vector<1x128xf32>
    %229 = arith.mulf %227, %228 : vector<1x128xf32>
    %230 = vector.extract_strided_slice %154 {offsets = [3, 0], sizes = [1, 128], strides = [1, 1]} : vector<6x128xf32> to vector<1x128xf32>
    %cst_48 = arith.constant 9.99999974E-6 : f32
    %231 = vector.broadcast %cst_48 : f32 to vector<1x128xf32>
    %232 = arith.addf %229, %231 : vector<1x128xf32>
    %233 = math.rsqrt %232 : vector<1x128xf32>
    %234 = arith.mulf %230, %233 : vector<1x128xf32>
    %235 = vector.broadcast %234 : vector<1x128xf32> to vector<2x128xf32>
    %236 = arith.mulf %224, %235 : vector<2x128xf32>
    %237 = vector.extract_strided_slice %155 {offsets = [3, 0], sizes = [1, 128], strides = [1, 1]} : vector<6x128xf32> to vector<1x128xf32>
    %238 = vector.broadcast %237 : vector<1x128xf32> to vector<2x128xf32>
    %239 = arith.addf %236, %238 : vector<2x128xf32>
    %cst_49 = arith.constant dense<0.000000e+00> : vector<128xf32>
    %240 = vector.multi_reduction <add>, %143, %cst_49 [0] : vector<2x128xf32> to vector<128xf32>
    %241 = vector.shape_cast %240 : vector<128xf32> to vector<1x128xf32>
    %cst_50 = arith.constant 5.000000e-01 : f32
    %242 = vector.broadcast %cst_50 : f32 to vector<1x128xf32>
    %243 = arith.mulf %241, %242 : vector<1x128xf32>
    %244 = vector.broadcast %243 : vector<1x128xf32> to vector<2x128xf32>
    %245 = arith.subf %143, %244 : vector<2x128xf32>
    %246 = arith.mulf %245, %245 : vector<2x128xf32>
    %cst_51 = arith.constant dense<0.000000e+00> : vector<128xf32>
    %247 = vector.multi_reduction <add>, %246, %cst_51 [0] : vector<2x128xf32> to vector<128xf32>
    %248 = vector.shape_cast %247 : vector<128xf32> to vector<1x128xf32>
    %cst_52 = arith.constant 5.000000e-01 : f32
    %249 = vector.broadcast %cst_52 : f32 to vector<1x128xf32>
    %250 = arith.mulf %248, %249 : vector<1x128xf32>
    %251 = vector.extract_strided_slice %154 {offsets = [4, 0], sizes = [1, 128], strides = [1, 1]} : vector<6x128xf32> to vector<1x128xf32>
    %cst_53 = arith.constant 9.99999974E-6 : f32
    %252 = vector.broadcast %cst_53 : f32 to vector<1x128xf32>
    %253 = arith.addf %250, %252 : vector<1x128xf32>
    %254 = math.rsqrt %253 : vector<1x128xf32>
    %255 = arith.mulf %251, %254 : vector<1x128xf32>
    %256 = vector.broadcast %255 : vector<1x128xf32> to vector<2x128xf32>
    %257 = arith.mulf %245, %256 : vector<2x128xf32>
    %258 = vector.extract_strided_slice %155 {offsets = [4, 0], sizes = [1, 128], strides = [1, 1]} : vector<6x128xf32> to vector<1x128xf32>
    %259 = vector.broadcast %258 : vector<1x128xf32> to vector<2x128xf32>
    %260 = arith.addf %257, %259 : vector<2x128xf32>
    %cst_54 = arith.constant dense<0.000000e+00> : vector<128xf32>
    %261 = vector.multi_reduction <add>, %153, %cst_54 [0] : vector<2x128xf32> to vector<128xf32>
    %262 = vector.shape_cast %261 : vector<128xf32> to vector<1x128xf32>
    %cst_55 = arith.constant 5.000000e-01 : f32
    %263 = vector.broadcast %cst_55 : f32 to vector<1x128xf32>
    %264 = arith.mulf %262, %263 : vector<1x128xf32>
    %265 = vector.broadcast %264 : vector<1x128xf32> to vector<2x128xf32>
    %266 = arith.subf %153, %265 : vector<2x128xf32>
    %267 = arith.mulf %266, %266 : vector<2x128xf32>
    %cst_56 = arith.constant dense<0.000000e+00> : vector<128xf32>
    %268 = vector.multi_reduction <add>, %267, %cst_56 [0] : vector<2x128xf32> to vector<128xf32>
    %269 = vector.shape_cast %268 : vector<128xf32> to vector<1x128xf32>
    %cst_57 = arith.constant 5.000000e-01 : f32
    %270 = vector.broadcast %cst_57 : f32 to vector<1x128xf32>
    %271 = arith.mulf %269, %270 : vector<1x128xf32>
    %272 = vector.extract_strided_slice %154 {offsets = [5, 0], sizes = [1, 128], strides = [1, 1]} : vector<6x128xf32> to vector<1x128xf32>
    %cst_58 = arith.constant 9.99999974E-6 : f32
    %273 = vector.broadcast %cst_58 : f32 to vector<1x128xf32>
    %274 = arith.addf %271, %273 : vector<1x128xf32>
    %275 = math.rsqrt %274 : vector<1x128xf32>
    %276 = arith.mulf %272, %275 : vector<1x128xf32>
    %277 = vector.broadcast %276 : vector<1x128xf32> to vector<2x128xf32>
    %278 = arith.mulf %266, %277 : vector<2x128xf32>
    %279 = vector.extract_strided_slice %155 {offsets = [5, 0], sizes = [1, 128], strides = [1, 1]} : vector<6x128xf32> to vector<1x128xf32>
    %280 = vector.broadcast %279 : vector<1x128xf32> to vector<2x128xf32>
    %281 = arith.addf %278, %280 : vector<2x128xf32>
    %282 = tpu.concatenate %176, %197, %218, %239, %260, %281 in 1 : vector<2x128xf32>, vector<2x128xf32>, vector<2x128xf32>, vector<2x128xf32>, vector<2x128xf32>, vector<2x128xf32> -> vector<2x768xf32>
    %283 = arith.truncf %282 : vector<2x768xf32> to vector<2x768xbf16>
    %c0_59 = arith.constant 0 : index
    %c0_60 = arith.constant 0 : index
    %284 = vector.load %arg5[%c0_59, %c0_60] : memref<768x128xbf16, #tpu.memory_space<vmem>>, vector<768x128xbf16>
    %cst_61 = arith.constant dense<0.000000e+00> : vector<2x128xf32>
    %285 = tpu.matmul %283, %284, %cst_61 {dimension_numbers = #tpu.dot_dimension_numbers<[1], [0], [0], [1], [0, 0, 1, 1], [], []>} : vector<2x768xbf16>, vector<768x128xbf16>, vector<2x128xf32> -> vector<2x128xf32>
    %c0_62 = arith.constant 0 : index
    %c0_63 = arith.constant 0 : index
    %286 = vector.load %arg6[%c0_62, %c0_63] : memref<1x128xf32, #tpu.memory_space<vmem>>, vector<1x128xf32>
    %287 = vector.broadcast %286 : vector<1x128xf32> to vector<2x128xf32>
    %288 = arith.addf %285, %287 : vector<2x128xf32>
    %c0_64 = arith.constant 0 : index
    %c0_65 = arith.constant 0 : index
    %289 = vector.load %arg7[%c0_64, %c0_65] : memref<2x128xf32, #tpu.memory_space<vmem>>, vector<2x128xf32>
    tpu.vector_store %arg7[%c0_64, %c0_65], %288 {strides = array<i32>} : memref<2x128xf32, #tpu.memory_space<vmem>>, vector<2x128xf32>,
    return
  }
  func.func @transform_0(%arg0: i32) -> (i32, i32) {
    %c0_i32 = arith.constant 0 : i32
    %c0_i32_0 = arith.constant 0 : i32
    %c0_i32_1 = arith.constant 0 : i32
    return %c0_i32, %c0_i32_0 : i32, i32
  }
  func.func @transform_1(%arg0: i32) -> (i32, i32) {
    %c0_i32 = arith.constant 0 : i32
    %c0_i32_0 = arith.constant 0 : i32
    %c0_i32_1 = arith.constant 0 : i32
    return %c0_i32, %c0_i32_0 : i32, i32
  }
  func.func @transform_2(%arg0: i32) -> (i32, i32) {
    %c0_i32 = arith.constant 0 : i32
    %c0_i32_0 = arith.constant 0 : i32
    %c0_i32_1 = arith.constant 0 : i32
    return %c0_i32, %c0_i32_0 : i32, i32
  }
  func.func @transform_3(%arg0: i32) -> (i32, i32) {
    %c0_i32 = arith.constant 0 : i32
    %c0_i32_0 = arith.constant 0 : i32
    %c0_i32_1 = arith.constant 0 : i32
    return %c0_i32, %c0_i32_0 : i32, i32
  }
  func.func @transform_4(%arg0: i32) -> (i32, i32) {
    %c0_i32 = arith.constant 0 : i32
    %c0_i32_0 = arith.constant 0 : i32
    %c0_i32_1 = arith.constant 0 : i32
    return %c0_i32, %c0_i32_0 : i32, i32
  }
  func.func @transform_5(%arg0: i32) -> (i32, i32) {
    %c0_i32 = arith.constant 0 : i32
    %c0_i32_0 = arith.constant 0 : i32
    %c0_i32_1 = arith.constant 0 : i32
    return %c0_i32, %c0_i32_0 : i32, i32
  }
  func.func @transform_6(%arg0: i32) -> (i32, i32) {
    %c0_i32 = arith.constant 0 : i32
    %c0_i32_0 = arith.constant 0 : i32
    %c0_i32_1 = arith.constant 0 : i32
    return %c0_i32, %c0_i32_0 : i32, i32
  }
}

</mosaic_0001>

<bundles_post_ra>
// kernel: zernike_rank_pooling_forward.1
= control target key start
LH: loop header
LB: loop body
LE: loop exit
PB: predicated region body
PF: predicated region fallthrough
CT: control target
= control target key end

     0   :  { %s2303_s0 = inlined_call_operand.vmem [shape: bf16[256,256], index: 0, kind: input, shape index: {}]   ;;  %s2304_s1 = inlined_call_operand.vmem [shape: bf16[16,256], index: 1, kind: input, shape index: {}]   ;;  %s2305_s2 = inlined_call_operand.vmem [shape: f32[6,128], index: 2, kind: input, shape index: {}]   ;;  %s2306_s3 = inlined_call_operand.vmem [shape: f32[6,128], index: 3, kind: input, shape index: {}]   ;;  %s2307_s4 = inlined_call_operand.vmem [shape: bf16[768,128], index: 4, kind: input, shape index: {}]   ;;  %s2308_s5 = inlined_call_operand.vmem [shape: f32[1,128], index: 5, kind: input, shape index: {}]   ;;  %s2309_s6 = inlined_call_operand.hbm [shape: f32[2,128], index: 6, kind: output, shape index: {}]  }
   0x1   :  { %v1278_v0 = vld [vmem:[%s2303_s0 + $0x70] sm:$0xf]  ;;  %v1557_v1 = vld [vmem:[%s2303_s0 + $0x74] sm:$0xf0]  ;;  %v1556_v5 = vld [vmem:[%s2303_s0 + $0x74] sm:$0xf] }
   0x2   :  { %v1342_v2 = vld [vmem:[%s2303_s0 + $0xf0] sm:$0xf]  ;;  %v1279_v3 = vor.u32 %v1557_v1, %v1278_v0  ;;  %v1573_v4 = vld [vmem:[%s2303_s0 + $0xf4] sm:$0xf0]  ;;  %v1280_v6 = vld [vmem:[%s2303_s0 + $0x78] sm:$0xf0] }
   0x3   :  { %v1343_v7 = vor.u32 %v1573_v4, %v1342_v2  ;;  %v1283_v8 = vor.u32 %v1556_v5, %v1280_v6  ;;  %v1572_v9 = vld [vmem:[%s2303_s0 + $0xf4] sm:$0xf]  ;;  %v1344_v10 = vld [vmem:[%s2303_s0 + $0xf8] sm:$0xf0]  ;;  %v1270_v11 = vld [vmem:[%s2303_s0 + $0x60] sm:$0xf] }
   0x4   :  { %228 = vmatpush.bf16.msra.mxu0 %v1279_v3  ;;  %v1347_v12 = vor.u32 %v1572_v9, %v1344_v10  ;;  %v1555_v13 = vld [vmem:[%s2303_s0 + $0x64] sm:$0xf0]  ;;  %v1334_v14 = vld [vmem:[%s2303_s0 + $0xe0] sm:$0xf]  ;;  %v1554_v18 = vld [vmem:[%s2303_s0 + $0x64] sm:$0xf] }
   0x5   :  { %v1571_v15 = vld [vmem:[%s2303_s0 + $0xe4] sm:$0xf0]  ;;  %242 = vmatpush.bf16.msra.mxu1 %v1343_v7  ;;  %256 = vmatpush.bf16.msra.mxu2 %v1283_v8  ;;  %v1271_v16 = vor.u32 %v1555_v13, %v1270_v11  ;;  %v1272_v19 = vld [vmem:[%s2303_s0 + $0x68] sm:$0xf0]  ;;  %v1570_v20 = vld [vmem:[%s2303_s0 + $0xe4] sm:$0xf] }
   0x6   :  { %v1335_v17 = vor.u32 %v1571_v15, %v1334_v14  ;;  %270 = vmatpush.bf16.msra.mxu3 %v1347_v12  ;;  %v1275_v21 = vor.u32 %v1554_v18, %v1272_v19  ;;  %v1336_v22 = vld [vmem:[%s2303_s0 + $0xe8] sm:$0xf0]  ;;  %v1262_v23 = vld [vmem:[%s2303_s0 + $0x50] sm:$0xf]  ;;  %v1553_v24 = vld [vmem:[%s2303_s0 + $0x54] sm:$0xf0] }
   0x7   :  { %v1339_v25 = vor.u32 %v1570_v20, %v1336_v22  ;;  %v1326_v26 = vld [vmem:[%s2303_s0 + $0xd0] sm:$0xf]  ;;  %v1569_v27 = vld [vmem:[%s2303_s0 + $0xd4] sm:$0xf0]  ;;  %v1552_v28 = vld [vmem:[%s2303_s0 + $0x54] sm:$0xf]  ;;  %v1263_v29 = vor.u32 %v1553_v24, %v1262_v23 }
   0x8   :  { %229 = vmatpush.bf16.msra.mxu0 %v1271_v16  ;;  %v1264_v30 = vld [vmem:[%s2303_s0 + $0x58] sm:$0xf0]  ;;  %v1568_v31 = vld [vmem:[%s2303_s0 + $0xd4] sm:$0xf]  ;;  %v1327_v33 = vor.u32 %v1569_v27, %v1326_v26  ;;  %v1254_v35 = vld [vmem:[%s2303_s0 + $0x40] sm:$0xf] }
   0x9   :  { %v1328_v32 = vld [vmem:[%s2303_s0 + $0xd8] sm:$0xf0]  ;;  %243 = vmatpush.bf16.msra.mxu1 %v1335_v17  ;;  %257 = vmatpush.bf16.msra.mxu2 %v1275_v21  ;;  %v1267_v34 = vor.u32 %v1552_v28, %v1264_v30  ;;  %v1551_v36 = vld [vmem:[%s2303_s0 + $0x44] sm:$0xf0]  ;;  %v1318_v37 = vld [vmem:[%s2303_s0 + $0xc0] sm:$0xf] }
   0xa   :  { %271 = vmatpush.bf16.msra.mxu3 %v1339_v25  ;;  %v1331_v38 = vor.u32 %v1568_v31, %v1328_v32  ;;  %v1567_v39 = vld [vmem:[%s2303_s0 + $0xc4] sm:$0xf0]  ;;  %v1550_v40 = vld [vmem:[%s2303_s0 + $0x44] sm:$0xf]  ;;  %v1256_v41 = vld [vmem:[%s2303_s0 + $0x48] sm:$0xf0]  ;;  %v1255_v44 = vor.u32 %v1551_v36, %v1254_v35 }
   0xb   :  { %v1566_v42 = vld [vmem:[%s2303_s0 + $0xc4] sm:$0xf]  ;;  %v1320_v43 = vld [vmem:[%s2303_s0 + $0xc8] sm:$0xf0]  ;;  %v1319_v45 = vor.u32 %v1567_v39, %v1318_v37  ;;  %v1259_v46 = vor.u32 %v1550_v40, %v1256_v41  ;;  %v1246_v47 = vld [vmem:[%s2303_s0 + $0x30] sm:$0xf] }
   0xc   :  { %230 = vmatpush.bf16.msra.mxu0 %v1263_v29  ;;  %v1549_v48 = vld [vmem:[%s2303_s0 + $0x34] sm:$0xf0]  ;;  %v1310_v49 = vld [vmem:[%s2303_s0 + $0xb0] sm:$0xf]  ;;  %v1323_v50 = vor.u32 %v1566_v42, %v1320_v43  ;;  %v1548_v52 = vld [vmem:[%s2303_s0 + $0x34] sm:$0xf] }
   0xd   :  { %244 = vmatpush.bf16.msra.mxu1 %v1327_v33  ;;  %258 = vmatpush.bf16.msra.mxu2 %v1267_v34  ;;  %v1565_v51 = vld [vmem:[%s2303_s0 + $0xb4] sm:$0xf0]  ;;  %v1248_v53 = vld [vmem:[%s2303_s0 + $0x38] sm:$0xf0]  ;;  %v1564_v54 = vld [vmem:[%s2303_s0 + $0xb4] sm:$0xf]  ;;  %v1247_v56 = vor.u32 %v1549_v48, %v1246_v47 }
   0xe   :  { %272 = vmatpush.bf16.msra.mxu3 %v1331_v38  ;;  %v1312_v55 = vld [vmem:[%s2303_s0 + $0xb8] sm:$0xf0]  ;;  %v1311_v57 = vor.u32 %v1565_v51, %v1310_v49  ;;  %v1251_v58 = vor.u32 %v1548_v52, %v1248_v53  ;;  %v1238_v59 = vld [vmem:[%s2303_s0 + $0x20] sm:$0xf]  ;;  %v1547_v60 = vld [vmem:[%s2303_s0 + $0x24] sm:$0xf0] }
   0xf   :  { %v1302_v61 = vld [vmem:[%s2303_s0 + $0xa0] sm:$0xf]  ;;  %v1315_v62 = vor.u32 %v1564_v54, %v1312_v55  ;;  %v1563_v63 = vld [vmem:[%s2303_s0 + $0xa4] sm:$0xf0]  ;;  %v1546_v0 = vld [vmem:[%s2303_s0 + $0x24] sm:$0xf]  ;;  %v1239_v4 = vor.u32 %v1547_v60, %v1238_v59 }
  0x10   :  { %231 = vmatpush.bf16.msra.mxu0 %v1255_v44  ;;  %v1240_v1 = vld [vmem:[%s2303_s0 + $0x28] sm:$0xf0]  ;;  %v1562_v2 = vld [vmem:[%s2303_s0 + $0xa4] sm:$0xf]  ;;  %v1303_v5 = vor.u32 %v1563_v63, %v1302_v61  ;;  %v1230_v7 = vld [vmem:[%s2303_s0 + $0x10] sm:$0xf] }
  0x11   :  { %245 = vmatpush.bf16.msra.mxu1 %v1319_v45  ;;  %259 = vmatpush.bf16.msra.mxu2 %v1259_v46  ;;  %v1304_v3 = vld [vmem:[%s2303_s0 + $0xa8] sm:$0xf0]  ;;  %v1243_v6 = vor.u32 %v1546_v0, %v1240_v1  ;;  %v1545_v8 = vld [vmem:[%s2303_s0 + $0x14] sm:$0xf0]  ;;  %v1294_v9 = vld [vmem:[%s2303_s0 + $0x90] sm:$0xf] }
  0x12   :  { %273 = vmatpush.bf16.msra.mxu3 %v1323_v50  ;;  %v1307_v10 = vor.u32 %v1562_v2, %v1304_v3  ;;  %v1561_v11 = vld [vmem:[%s2303_s0 + $0x94] sm:$0xf0]  ;;  %v1544_v12 = vld [vmem:[%s2303_s0 + $0x14] sm:$0xf]  ;;  %v1232_v13 = vld [vmem:[%s2303_s0 + $0x18] sm:$0xf0]  ;;  %v1231_v16 = vor.u32 %v1545_v8, %v1230_v7 }
  0x13   :  { %v1560_v14 = vld [vmem:[%s2303_s0 + $0x94] sm:$0xf]  ;;  %v1296_v15 = vld [vmem:[%s2303_s0 + $0x98] sm:$0xf0] }
  0x14   :  { %232 = vmatpush.bf16.msra.mxu0 %v1247_v56 }
  0x15   :  { %246 = vmatpush.bf16.msra.mxu1 %v1311_v57  ;;  %260 = vmatpush.bf16.msra.mxu2 %v1251_v58 }
  0x16   :  { %274 = vmatpush.bf16.msra.mxu3 %v1315_v62 }
  0x18   :  { %233 = vmatpush.bf16.msra.mxu0 %v1239_v4 }
  0x19   :  { %11 = vsyncpa [#allocation3], 0  ;;  %247 = vmatpush.bf16.msra.mxu1 %v1303_v5  ;;  %261 = vmatpush.bf16.msra.mxu2 %v1243_v6  ;;  %v1295_v17 = vor.u32 %v1561_v11, %v1294_v9  ;;  %v1235_v18 = vor.u32 %v1544_v12, %v1232_v13  ;;  %v1222_v19 = vld [vmem:[%s2303_s0] sm:$0xf]  ;;  %v1543_v20 = vld [vmem:[%s2303_s0 + $0x4] sm:$0xf0]  ;;  %v1299_v22 = vor.u32 %v1560_v14, %v1296_v15 }
  0x1a   :  { %v1286_v21 = vld [vmem:[%s2303_s0 + $0x80] sm:$0xf]  ;;  %275 = vmatpush.bf16.msra.mxu3 %v1307_v10  ;;  %v1559_v23 = vld [vmem:[%s2303_s0 + $0x84] sm:$0xf0]  ;;  %v1542_v24 = vld [vmem:[%s2303_s0 + $0x4] sm:$0xf]  ;;  %v1223_v28 = vor.u32 %v1543_v20, %v1222_v19 }
  0x1b   :  { %v1224_v25 = vld [vmem:[%s2303_s0 + $0x8] sm:$0xf0]  ;;  %v1558_v26 = vld [vmem:[%s2303_s0 + $0x84] sm:$0xf]  ;;  %v1214_v29 = vld [vmem:[%s2304_s1] sm:$0xf]  ;;  %v1287_v31 = vor.u32 %v1559_v23, %v1286_v21 }
  0x1c   :  { %v1288_v27 = vld [vmem:[%s2303_s0 + $0x88] sm:$0xf0]  ;;  %234 = vmatpush.bf16.msra.mxu0 %v1231_v16  ;;  %v1541_v30 = vld [vmem:[%s2304_s1 + $0x4] sm:$0xf0]  ;;  %v1227_v32 = vor.u32 %v1542_v24, %v1224_v25  ;;  %v1540_v33 = vld [vmem:[%s2304_s1 + $0x4] sm:$0xf] }
  0x1d   :  { %248 = vmatpush.bf16.msra.mxu1 %v1295_v17  ;;  %262 = vmatpush.bf16.msra.mxu2 %v1235_v18  ;;  %v1216_v34 = vld [vmem:[%s2304_s1 + $0x8] sm:$0xf0]  ;;  %v1291_v35 = vor.u32 %v1558_v26, %v1288_v27  ;;  %v1215_v36 = vor.u32 %v1541_v30, %v1214_v29  ;;  %v1674_v38 = vmov 1983009808   ;;  %v1675_v47 = vmov 1934713408  }
  0x1e   :  { %276 = vmatpush.bf16.msra.mxu3 %v1299_v22  ;;  %v1219_v37 = vor.u32 %v1540_v33, %v1216_v34  ;;  %v288_v39 = vunpack.c.l.s4 %v1674_v38  ;;  %v310_v48 = vunpack.c.l.s4 %v1675_v47  ;;  %vm285_vm0 = vcmask 1047556   ;;  %v1581_v22 = vld [vmem:[%s2307_s4 + $0x38] sm:$0xff]  ;;  %v1580_v34 = vld [vmem:[%s2307_s4 + $0x30] sm:$0xff]  ;;  %s1676_s30 = smov [#allocation2]   ;;  %s1203_s10 = sshll.u32 %s2309_s6, 4  ;;  %s1204_s10 = int_to_ptr.hbm [resolvable:$true] %s1203_s10 }
  0x1f   :  { %vm518_vm1 = vcmask 1041408   ;;  %s1201_s7 = sshll.u32 %s1676_s30, 4  ;;  %s1202_s7 = int_to_ptr.vmem [resolvable:$true] %s1201_s7 }
  0x20   :  { %235 = vmatpush.bf16.msra.mxu0 %v1223_v28  ;;  %v289_v45 = vunpack.c.0.s8 %v288_v39  ;;  %v311_v54 = vunpack.c.0.s8 %v310_v48 }
  0x21   :  { %249 = vmatpush.bf16.msra.mxu1 %v1287_v31  ;;  %263 = vmatpush.bf16.msra.mxu2 %v1227_v32 }
  0x22   :  { %277 = vmatpush.bf16.msra.mxu3 %v1291_v35 }
  0x23   :  { %236 = vmatmul.bf16.vlgmr.msra.gmra.mxu0 %v1215_v36 }
  0x24   :  { %250 = vmatmul.bf16.vlgmr.msra.gmra.mxu1 %v1219_v37  ;;  %264 = vmatmul.bf16.vlgmr.msra.gmra.mxu2 %v1215_v36 }
  0x25   :  { %278 = vmatmul.bf16.vlgmr.msra.gmra.mxu3 %v1219_v37  ;;  %1117 = vmatpush.bf16.msrb.mxu0 %v1581_v22 }
  0x29   :  { %1118 = vmatpush.bf16.msrb.mxu0 %v1580_v34 }
  0xa0   :  { %v237_v40 = vpop.f32.mrf.mxu0 }
  0xa1   :  { %v251_v41 = vpop.f32.mrf.mxu1 }
  0xa2   :  { %v252_v43 = vadd.f32 %v251_v41, %v237_v40 }
  0xa4   :  { %v284_v50 = vrot.slane %v252_v43, 4  ;;  %v290_v51 = vperm.slane %v252_v43, %v289_v45 }
  0xa6   :  { %v286_v57 = vsel %vm285_vm0, 0.0, %v284_v50  ;;  %v307_v7 = vrot.slane %v290_v51, 4  ;;  %v1578_v50 = vld [vmem:[%s2307_s4 + $0x20] sm:$0xff] }
  0xa7   :  { %v265_v42 = vpop.f32.mrf.mxu2  ;;  %v294_v63 = vperm.slane %v286_v57, %v289_v45 }
  0xa8   :  { %v279_v44 = vpop.f32.mrf.mxu3  ;;  %v239_v0 = vpop.f32.mrf.mxu0 }
  0xa9   :  { %v280_v46 = vadd.f32 %v279_v44, %v265_v42  ;;  %v253_v1 = vpop.f32.mrf.mxu1  ;;  %v319_v8 = vrot.slane %v294_v63, 4 }
  0xaa   :  { %v254_v5 = vadd.f32 %v253_v1, %v239_v0 }
  0xab   :  { %v300_v49 = vperm.slane %v280_v46, %v289_v45  ;;  %v295_v53 = vrot.slane %v280_v46, 4  ;;  %v1579_v46 = vld [vmem:[%s2307_s4 + $0x28] sm:$0xff] }
  0xac   :  { %v340_v14 = vperm.slane %v254_v5, %v289_v45  ;;  %1119 = vmatpush.bf16.msrb.mxu0 %v1579_v46 }
  0xad   :  { %v305_v52 = vrot.slane %v300_v49, 4  ;;  %v296_v61 = vsel %vm285_vm0, 0.0, %v295_v53  ;;  %v308_v15 = vsel %vm285_vm0, %v300_v49, %v307_v7 }
  0xae   :  { %v304_v3 = vperm.slane %v296_v61, %v289_v45  ;;  %v1933_v24 = vperm.slane %v308_v15, %v311_v54 }
  0xaf   :  { %v306_v55 = vsel %vm285_vm0, %v305_v52, %v290_v51  ;;  %v267_v56 = vpop.f32.mrf.mxu2 }
  0xb0   :  { %v1918_v58 = vperm.slane %v306_v55, %v311_v54  ;;  %v281_v59 = vpop.f32.mrf.mxu3  ;;  %v317_v10 = vrot.slane %v304_v3, 4  ;;  %v320_v16 = vsel %vm285_vm0, %v304_v3, %v319_v8  ;;  %v331_v37 = vrot.slane %v1933_v24, 4  ;;  %1120 = vmatpush.bf16.msrb.mxu0 %v1578_v50 }
  0xb1   :  { %v282_v60 = vadd.f32 %v281_v59, %v267_v56  ;;  %v328_v25 = vperm.slane %v320_v16, %v311_v54 }
  0xb2   :  { %v353_v62 = vadd.f32 1e-06, %v1918_v58  ;;  %v437_v2 = vand.u32 2147483647, %v1918_v58  ;;  %v318_v19 = vsel %vm285_vm0, %v317_v10, %v294_v63  ;;  %v329_v31 = vrot.slane %v1918_v58, 4 }
  0xb3   :  { %v344_v4 = vperm.slane %v282_v60, %v289_v45  ;;  %v1935_v30 = vperm.slane %v318_v19, %v311_v54  ;;  %v335_v38 = vrot.slane %v328_v25, 4  ;;  %v1958_v51 = vsel %vm285_vm0, 0.0, %v331_v37 }
  0xb4   :  { %1626 = vrcp.f32 %v353_v62  ;;  %v519_v6 = vsel %vm518_vm1, %v437_v2, 0.0  ;;  %v365_v26 = vand.u32 2147483648, %v353_v62  ;;  %v363_v28 = vand.u32 2147483647, %v353_v62 }
  0xb5   :  { %v520_v9 = vrot.slane %v519_v6, 4  ;;  %v345_v11 = vrot.slane %v344_v4, 4  ;;  %vm359_vm3 = vweird.f32 %v353_v62  ;;  %v1945_v40 = vsel %vm285_vm0, 0.0, %v329_v31 }
  0xb6   :  { %v366_v36 = vor.u32 1.1754944e-38, %v365_v26  ;;  %vm364_vm5 = vcmp.eq.f32.partialorder %v363_v28, 8.507059e+37  ;;  %v333_v42 = vrot.slane %v1935_v30, 4  ;;  %v336_v52 = vsel %vm285_vm0, 0.0, %v335_v38 }
  0xb7   :  { %v521_v12 = vadd.f32 %v520_v9, %v519_v6  ;;  %v346_v21 = vsel %vm285_vm0, %v345_v11, %v340_v14 }
  0xb8   :  { %v1938_v32 = vperm.slane %v346_v21, %v311_v54  ;;  %v334_v53 = vsel %vm285_vm0, 0.0, %v333_v42  ;;  %v1576_v21 = vld [vmem:[%s2307_s4 + $0x10] sm:$0xff] }
  0xb9   :  { %v522_v18 = vrot.slane %v521_v12, 2 }
  0xba   :  { %v1627_v13 = vpop.eup %1626  ;;  %v351_v43 = vrot.slane %v1938_v32, 4 }
  0xbb   :  { %v355_v17 = vmul.f32 %v1627_v13, %v353_v62  ;;  %v523_v23 = vadd.f32 %v522_v18, %v521_v12  ;;  %vm360_vm2 = vweird.f32 %v1627_v13 }
  0xbc   :  { %vm361_vm4 = vmor %vm359_vm3, %vm360_vm2  ;;  %v1963_v54 = vsel %vm285_vm0, 0.0, %v351_v43 }
  0xbd   :  { %v356_v20 = vsub.f32 1.0, %v355_v17  ;;  %v524_v29 = vrot.slane %v523_v23, 1 }
  0xbf   :  { %v357_v27 = vmul.f32 %v1627_v13, %v356_v20  ;;  %v525_v35 = vadd.f32 %v524_v29, %v523_v23 }
  0xc1   :  { %v358_v33 = vadd.f32 %v1627_v13, %v357_v27  ;;  %v526_v47 = vmul.f32 0.5, %v525_v35 }
  0xc3   :  { %v362_v39 = vsel %vm361_vm4, %v1627_v13, %v358_v33  ;;  %v1972_v59 = vsub.f32 %v437_v2, %v526_v47  ;;  %v1577_v2 = vld [vmem:[%s2307_s4 + $0x18] sm:$0xff] }
  0xc4   :  { %v367_v41 = vsel %vm364_vm5, %v366_v36, %v362_v39  ;;  %1121 = vmatpush.bf16.msrb.mxu0 %v1577_v2 }
  0xc5   :  { %v369_v44 = vmul.f32 %v367_v41, %v1945_v40  ;;  %v371_v45 = vmul.f32 %v367_v41, %v1933_v24  ;;  %v528_v12 = vmul.f32 %v1972_v59, %v1972_v59 }
  0xc7   :  { %v370_v48 = vsub.f32 0.0, %v369_v44  ;;  %v372_v49 = vsub.f32 0.0, %v371_v45 }
  0xc8   :  { %1122 = vmatpush.bf16.msrb.mxu0 %v1576_v21 }
  0xc9   :  { %v1965_v55 = vmul.f32 %v370_v48, %v370_v48  ;;  %v1967_v56 = vmul.f32 2.0, %v370_v48  ;;  %v385_v57 = vmul.f32 %v370_v48, %v1933_v24  ;;  %v387_v60 = vmul.f32 %v372_v49, %v1945_v40 }
  0xca   :  { %v396_v61 = vmul.f32 3.0, %v370_v48  ;;  %v405_v62 = vmul.f32 %v372_v49, %v1958_v51  ;;  %v375_v63 = vmul.f32 %v372_v49, %v370_v48  ;;  %v376_v7 = vmul.f32 %v370_v48, %v1918_v58 }
  0xcb   :  { %v386_v0 = vadd.f32 %v385_v57, %v1935_v30  ;;  %v399_v1 = vmul.f32 3.0, %v1965_v55  ;;  %v402_v3 = vmul.f32 %v1965_v55, %v370_v48  ;;  %v407_v4 = vmul.f32 %v1967_v56, %v1935_v30 }
  0xcc   :  { %v397_v5 = vmul.f32 %v396_v61, %v1958_v51  ;;  %v406_v6 = vadd.f32 %v405_v62, %v336_v52  ;;  %v378_v8 = vmul.f32 %v372_v49, %v1918_v58  ;;  %v374_v11 = vmul.f32 %v372_v49, %v372_v49 }
  0xcd   :  { %v388_v9 = vadd.f32 %v387_v60, %v386_v0  ;;  %v400_v10 = vmul.f32 %v399_v1, %v1945_v40  ;;  %v403_v14 = vmul.f32 %v402_v3, %v1918_v58  ;;  %v389_v16 = vmul.f32 %v375_v63, %v1918_v58 }
  0xce   :  { %v398_v13 = vadd.f32 %v397_v5, %v328_v25  ;;  %v408_v15 = vadd.f32 %v407_v4, %v406_v6  ;;  %v377_v17 = vadd.f32 %v376_v7, %v1945_v40  ;;  %v391_v18 = vmul.f32 2.0, %v372_v49 }
  0xcf   :  { %v409_v19 = vmul.f32 2.0, %v375_v63  ;;  %v414_v20 = vmul.f32 %v1965_v55, %v372_v49  ;;  %v379_v23 = vadd.f32 %v378_v8, %v1933_v24  ;;  %v412_v25 = vmul.f32 %v1965_v55, %v1933_v24 }
  0xd0   :  { %v401_v22 = vadd.f32 %v400_v10, %v398_v13  ;;  %v417_v26 = vmul.f32 %v370_v48, %v334_v53  ;;  %v419_v28 = vmul.f32 %v391_v18, %v1935_v30  ;;  %v423_v29 = vmul.f32 %v374_v11, %v1945_v40  ;;  %v1575_v30 = vld [vmem:[%s2307_s4 + $0x8] sm:$0xff] }
  0xd1   :  { %v410_v27 = vmul.f32 %v409_v19, %v1945_v40  ;;  %v425_v31 = vmul.f32 %v374_v11, %v370_v48  ;;  %v392_v33 = vmul.f32 %v391_v18, %v1933_v24  ;;  %v415_v34 = vmul.f32 %v414_v20, %v1918_v58  ;;  %1123 = vmatpush.bf16.msrb.mxu0 %v1575_v30 }
  0xd2   :  { %v418_v35 = vadd.f32 %v417_v26, %v1938_v32  ;;  %v421_v36 = vmul.f32 %v409_v19, %v1933_v24  ;;  %v404_v37 = vadd.f32 %v403_v14, %v401_v22  ;;  %v428_v39 = vmul.f32 3.0, %v372_v49 }
  0xd3   :  { %v411_v38 = vadd.f32 %v410_v27, %v408_v15  ;;  %v431_v41 = vmul.f32 3.0, %v374_v11  ;;  %v434_v43 = vmul.f32 %v374_v11, %v372_v49  ;;  %v438_v44 = vmul.f32 %v377_v17, %v377_v17  ;;  %v1574_v49 = vld [vmem:[%s2307_s4] sm:$0xff] }
  0xd4   :  { %v420_v42 = vadd.f32 %v419_v28, %v418_v35  ;;  %v439_v45 = vmul.f32 %v379_v23, %v379_v23  ;;  %v426_v47 = vmul.f32 %v425_v31, %v1918_v58  ;;  %v429_v48 = vmul.f32 %v428_v39, %v334_v53 }
  0xd5   :  { %v413_v46 = vadd.f32 %v412_v25, %v411_v38  ;;  %v432_v32 = vmul.f32 %v431_v41, %v1933_v24  ;;  %v393_v50 = vadd.f32 %v392_v33, %v334_v53  ;;  %v435_v57 = vmul.f32 %v434_v43, %v1918_v58  ;;  %1124 = vmatpush.bf16.msrb.mxu0 %v1574_v49  ;;  %v1589_v43 = vld [vmem:[%s2307_s4 + $0x78] sm:$0xff]  ;;  %v1604_v49 = vld [vmem:[%s2307_s4 + $0xf0] sm:$0xff] }
  0xd6   :  { %v422_v52 = vadd.f32 %v421_v36, %v420_v42  ;;  %v2013_v60 = vadd.f32 %v439_v45, %v438_v44  ;;  %v430_v62 = vadd.f32 %v429_v48, %v1963_v54  ;;  %v529_v63 = vsel %vm518_vm1, %v528_v12, 0.0  ;;  %1130 = vmatpush.bf16.msrb.mxu1 %v1589_v43  ;;  %v1588_v48 = vld [vmem:[%s2307_s4 + $0x70] sm:$0xff] }
  0xd7   :  { %v416_v61 = vadd.f32 %v415_v34, %v413_v46  ;;  %v381_v0 = vmul.f32 %v1967_v56, %v1945_v40  ;;  %v530_v53 = vrot.slane %v529_v63, 4  ;;  %v383_v1 = vmul.f32 %v1965_v55, %v1918_v58 }
  0xd8   :  { %v424_v24 = vadd.f32 %v423_v29, %v422_v52  ;;  %v390_v3 = vadd.f32 %v389_v16, %v388_v9  ;;  %v433_v4 = vadd.f32 %v432_v32, %v430_v62  ;;  %v394_v5 = vmul.f32 %v374_v11, %v1918_v58  ;;  %v1596_v32 = vld [vmem:[%s2307_s4 + $0xb0] sm:$0xff]  ;;  %v1605_v52 = vld [vmem:[%s2307_s4 + $0xf8] sm:$0xff] }
  0xd9   :  { %v499_v2 = vmul.f32 3.0, %v416_v61  ;;  %v382_v54 = vadd.f32 %v381_v0, %v1958_v51  ;;  %v531_v7 = vadd.f32 %v530_v53, %v529_v63  ;;  %1628 = vrsqrt.f32 %v2013_v60  ;;  %1156 = vmatpush.bf16.msrb.mxu3 %v1605_v52  ;;  %v1613_v63 = vld [vmem:[%s2307_s4 + $0x138] sm:$0xff]  ;;  %v1587_v53 = vld [vmem:[%s2307_s4 + $0x68] sm:$0xff] }
  0xda   :  { %v427_v6 = vadd.f32 %v426_v47, %v424_v24  ;;  %v458_v8 = vmul.f32 2.0, %v390_v3  ;;  %v436_v10 = vadd.f32 %v435_v57, %v433_v4  ;;  %v476_v12 = vmul.f32 2.0, %v377_v17  ;;  %1131 = vmatpush.bf16.msrb.mxu1 %v1588_v48  ;;  %1169 = vmatpush.bf16.msra.mxu0 %v1613_v63 }
  0xdb   :  { %v384_v40 = vadd.f32 %v383_v1, %v382_v54  ;;  %v395_v56 = vadd.f32 %v394_v5, %v393_v50  ;;  %v532_v55 = vrot.slane %v531_v7, 2  ;;  %v480_v11 = vmul.f32 2.0, %v379_v23  ;;  %v1595_v1 = vld [vmem:[%s2307_s4 + $0xa8] sm:$0xff] }
  0xdc   :  { %v474_v13 = vadd.f32 %v427_v6, %v404_v37  ;;  %v497_v14 = vmul.f32 3.0, %v427_v6  ;;  %v460_v9 = vmul.f32 %v458_v8, %v458_v8  ;;  %v478_v15 = vadd.f32 %v436_v10, %v416_v61 }
  0xdd   :  { %v500_v16 = vsub.f32 %v499_v2, %v436_v10  ;;  %v453_v18 = vadd.f32 %v395_v56, %v384_v40  ;;  %v457_v51 = vsub.f32 %v384_v40, %v395_v56  ;;  %v533_v21 = vadd.f32 %v532_v55, %v531_v7  ;;  %1157 = vmatpush.bf16.msrb.mxu3 %v1604_v49  ;;  %v1603_v10 = vld [vmem:[%s2307_s4 + $0xe8] sm:$0xff] }
  0xde   :  { %v475_v19 = vmul.f32 3.0, %v474_v13  ;;  %v498_v20 = vsub.f32 %v404_v37, %v497_v14  ;;  %v479_v22 = vmul.f32 3.0, %v478_v15  ;;  %vm448_vm6 = vcmp.eq.f32.partialorder %v2013_v60, inf  ;;  %1132 = vmatpush.bf16.msrb.mxu1 %v1587_v53  ;;  %v1586_v13 = vld [vmem:[%s2307_s4 + $0x60] sm:$0xff] }
  0xdf   :  { %v502_v25 = vmul.f32 %v500_v16, %v500_v16  ;;  %v454_v26 = vmul.f32 2.0, %v453_v18  ;;  %v459_v27 = vmul.f32 %v457_v51, %v457_v51  ;;  %v1629_v17 = vpop.eup %1628  ;;  %v534_v31 = vrot.slane %v533_v21, 1  ;;  %v1594_v14 = vld [vmem:[%s2307_s4 + $0xa0] sm:$0xff] }
  0xe0   :  { %v477_v28 = vsub.f32 %v475_v19, %v476_v12  ;;  %v501_v29 = vmul.f32 %v498_v20, %v498_v20  ;;  %v481_v33 = vsub.f32 %v479_v22, %v480_v11  ;;  %v442_v36 = vmul.f32 %v1629_v17, %v2013_v60 }
  0xe1   :  { %v455_v34 = vsub.f32 %v454_v26, %v1918_v58  ;;  %v2028_v35 = vadd.f32 %v460_v9, %v459_v27  ;;  %v535_v23 = vadd.f32 %v534_v31, %v533_v21  ;;  %v1597_v58 = vld [vmem:[%s2307_s4 + $0xb8] sm:$0xff]  ;;  %v451_v6 = vand.u32 2147483648, %v2013_v60  ;;  %1158 = vmatpush.bf16.msrb.mxu3 %v1603_v10 }
  0xe2   :  { %v482_v38 = vmul.f32 %v477_v28, %v477_v28  ;;  %v2031_v39 = vadd.f32 %v502_v25, %v501_v29  ;;  %v483_v37 = vmul.f32 %v481_v33, %v481_v33  ;;  %v443_v30 = vmul.f32 %v1629_v17, %v442_v36  ;;  %1143 = vmatpush.bf16.msrb.mxu2 %v1597_v58  ;;  %v1585_v27 = vld [vmem:[%s2307_s4 + $0x58] sm:$0xff]  ;;  %v1584_v58 = vld [vmem:[%s2307_s4 + $0x50] sm:$0xff] }
  0xe3   :  { %v2033_v41 = vand.u32 2147483647, %v455_v34  ;;  %1630 = vrsqrt.f32 %v2028_v35  ;;  %v536_v42 = vmul.f32 0.5, %v535_v23  ;;  %vm450_vm7 = vcmp.eq.f32.partialorder %v2013_v60, 0.0  ;;  %1133 = vmatpush.bf16.msrb.mxu1 %v1586_v13 }
  0xe4   :  { %1632 = vrsqrt.f32 %v2031_v39  ;;  %v2043_v44 = vadd.f32 %v483_v37, %v482_v38  ;;  %v444_v46 = vmul.f32 0.5, %v443_v30  ;;  %vm469_vm8 = vcmp.eq.f32.partialorder %v2028_v35, inf }
  0xe5   :  { %v587_v45 = vsel %vm518_vm1, %v2033_v41, 0.0  ;;  %v2047_v47 = vadd.f32 1e-05, %v536_v42  ;;  %vm471_vm9 = vcmp.eq.f32.partialorder %v2028_v35, 0.0  ;;  %v472_v25 = vand.u32 2147483648, %v2028_v35 }
  0xe6   :  { %v588_v50 = vrot.slane %v587_v45, 4  ;;  %v445_v57 = vsub.f32 1.5, %v444_v46  ;;  %1634 = vrsqrt.f32 %v2043_v44  ;;  %1144 = vmatpush.bf16.msrb.mxu2 %v1596_v32  ;;  %vm492_vm10 = vcmp.eq.f32.partialorder %v2043_v44, inf }
  0xe7   :  { %1636 = vrsqrt.f32 %v2047_v47  ;;  %vm544_vm11 = vweird.f32 %v2047_v47  ;;  %vm494_vm12 = vcmp.eq.f32.partialorder %v2043_v44, 0.0  ;;  %vm511_vm13 = vcmp.eq.f32.partialorder %v2031_v39, inf  ;;  %1134 = vmatpush.bf16.msrb.mxu1 %v1585_v27 }
  0xe8   :  { %v589_v61 = vadd.f32 %v588_v50, %v587_v45  ;;  %v446_v0 = vmul.f32 %v1629_v17, %v445_v57  ;;  %v1593_v17 = vld [vmem:[%s2307_s4 + $0x98] sm:$0xff]  ;;  %vm513_vm15 = vcmp.eq.f32.partialorder %v2031_v39, 0.0  ;;  %v514_v32 = vand.u32 2147483648, %v2031_v39  ;;  %v2133_v50 = vld [vmem:[%s2305_s2] sm:$0x3f] }
  0xe9   :  { %v1631_v62 = vpop.eup %1630 }
  0xea   :  { %v1633_v24 = vpop.eup %1632  ;;  %v590_v3 = vrot.slane %v589_v61, 2  ;;  %v463_v4 = vmul.f32 %v1631_v62, %v2028_v35  ;;  %v447_v2 = vmul.f32 %v446_v0, %v2013_v60  ;;  %1145 = vmatpush.bf16.msrb.mxu2 %v1595_v1 }
  0xeb   :  { %v505_v54 = vmul.f32 %v1633_v24, %v2031_v39  ;;  %1135 = vmatpush.bf16.msrb.mxu1 %v1584_v58  ;;  %v1612_v58 = vld [vmem:[%s2307_s4 + $0x130] sm:$0xff] }
  0xec   :  { %v591_v5 = vadd.f32 %v590_v3, %v589_v61  ;;  %v464_v7 = vmul.f32 %v1631_v62, %v463_v4  ;;  %v1635_v8 = vpop.eup %1634  ;;  %v449_v12 = vsel %vm448_vm6, %v2013_v60, %v447_v2  ;;  %v1591_v2 = vld [vmem:[%s2307_s4 + $0x88] sm:$0xff]  ;;  %1170 = vmatpush.bf16.msra.mxu0 %v1612_v58 }
  0xed   :  { %v506_v40 = vmul.f32 %v1633_v24, %v505_v54  ;;  %v2082_v56 = vpop.eup %1636  ;;  %v2090_v9 = vsel %vm450_vm7, %v451_v6, %v449_v12  ;;  %v486_v16 = vmul.f32 %v1635_v8, %v2043_v44  ;;  %v1607_v58 = vld [vmem:[%s2307_s4 + $0x108] sm:$0xff] }
  0xee   :  { %v592_v55 = vrot.slane %v591_v5, 1  ;;  %v465_v15 = vmul.f32 0.5, %v464_v7  ;;  %v539_v60 = vmul.f32 %v2082_v56, %v2047_v47  ;;  %v553_v18 = vsel %vm518_vm1, %v2090_v9, 0.0  ;;  %1146 = vmatpush.bf16.msrb.mxu2 %v1594_v14 }
  0xef   :  { %v507_v51 = vmul.f32 0.5, %v506_v40  ;;  %v554_v11 = vrot.slane %v553_v18, 4  ;;  %v487_v21 = vmul.f32 %v1635_v8, %v486_v16  ;;  %vm545_vm14 = vweird.f32 %v2082_v56 }
  0xf0   :  { %v593_v19 = vadd.f32 %v592_v55, %v591_v5  ;;  %v466_v20 = vsub.f32 1.5, %v465_v15  ;;  %v540_v22 = vmul.f32 %v2082_v56, %v539_v60  ;;  %vm546_vm0 = vmor %vm544_vm11, %vm545_vm14  ;;  %v495_v5 = vand.u32 2147483648, %v2043_v44 }
  0xf1   :  { %v508_v26 = vsub.f32 1.5, %v507_v51  ;;  %v555_v29 = vadd.f32 %v554_v11, %v553_v18  ;;  %v488_v33 = vmul.f32 0.5, %v487_v21  ;;  %v1582_v51 = vld [vmem:[%s2307_s4 + $0x40] sm:$0xff] }
  0xf2   :  { %v594_v28 = vmul.f32 0.5, %v593_v19  ;;  %v467_v31 = vmul.f32 %v1631_v62, %v466_v20  ;;  %v541_v34 = vmul.f32 0.5, %v540_v22  ;;  %1147 = vmatpush.bf16.msrb.mxu2 %v1593_v17  ;;  %v1621_v20 = vld [vmem:[%s2307_s4 + $0x178] sm:$0xff] }
  0xf3   :  { %v509_v36 = vmul.f32 %v1633_v24, %v508_v26  ;;  %v556_v23 = vrot.slane %v555_v29, 2  ;;  %v489_v30 = vsub.f32 1.5, %v488_v33  ;;  %v2157_v24 = vld [vmem:[%s2306_s3] sm:$0x3f] }
  0xf4   :  { %v2112_v38 = vsub.f32 %v2033_v41, %v594_v28  ;;  %v468_v37 = vmul.f32 %v467_v31, %v2028_v35  ;;  %v542_v42 = vsub.f32 1.5, %v541_v34  ;;  %v1592_v41 = vld [vmem:[%s2307_s4 + $0x90] sm:$0xff] }
  0xf5   :  { %v510_v43 = vmul.f32 %v509_v36, %v2031_v39  ;;  %v557_v46 = vadd.f32 %v556_v23, %v555_v29  ;;  %v490_v61 = vmul.f32 %v1635_v8, %v489_v30 }
  0xf6   :  { %v596_v45 = vmul.f32 %v2112_v38, %v2112_v38  ;;  %v470_v48 = vsel %vm469_vm8, %v2028_v35, %v468_v37  ;;  %v543_v52 = vmul.f32 %v2082_v56, %v542_v42  ;;  %1148 = vmatpush.bf16.msrb.mxu2 %v1592_v41  ;;  %v1620_v41 = vld [vmem:[%s2307_s4 + $0x170] sm:$0xff] }
  0xf7   :  { %v2138_v57 = vsel %vm471_vm9, %v472_v25, %v470_v48  ;;  %v512_v62 = vsel %vm511_vm13, %v2031_v39, %v510_v43  ;;  %v558_v63 = vrot.slane %v557_v46, 1  ;;  %v491_v3 = vmul.f32 %v490_v61, %v2043_v44  ;;  %v1583_v39 = vld [vmem:[%s2307_s4 + $0x48] sm:$0xff]  ;;  %v1602_v43 = vld [vmem:[%s2307_s4 + $0xe0] sm:$0xff]  ;;  %v1601_v61 = vld [vmem:[%s2307_s4 + $0xd8] sm:$0xff] }
  0xf8   :  { %v597_v49 = vsel %vm518_vm1, %v596_v45, 0.0  ;;  %v621_v0 = vsel %vm518_vm1, %v2138_v57, 0.0  ;;  %v2152_v35 = vsel %vm513_vm15, %v514_v32, %v512_v62  ;;  %v547_v53 = vsel %vm546_vm0, %v2082_v56, %v543_v52  ;;  %1136 = vmatpush.bf16.msrb.mxu1 %v1583_v39  ;;  %1159 = vmatpush.bf16.msrb.mxu3 %v1602_v43  ;;  %v1611_v62 = vld [vmem:[%s2307_s4 + $0x128] sm:$0xff] }
  0xf9   :  { %v598_v1 = vrot.slane %v597_v49, 4  ;;  %v622_v47 = vrot.slane %v621_v0, 4  ;;  %v548_v4 = vmul.f32 %v547_v53, %v2133_v50  ;;  %v559_v54 = vadd.f32 %v558_v63, %v557_v46  ;;  %1171 = vmatpush.bf16.msra.mxu0 %v1611_v62 }
  0xfa   :  { %v689_v6 = vsel %vm518_vm1, %v2152_v35, 0.0  ;;  %v493_v10 = vsel %vm492_vm10, %v2043_v44, %v491_v3  ;;  %v551_v56 = vperm.slane %v2157_v24, 0  ;;  %1149 = vmatpush.bf16.msrb.mxu2 %v1591_v2  ;;  %v1590_v44 = vld [vmem:[%s2307_s4 + $0x80] sm:$0xff] }
  0xfb   :  { %v599_v7 = vadd.f32 %v598_v1, %v597_v49  ;;  %v623_v8 = vadd.f32 %v622_v47, %v621_v0  ;;  %v690_v12 = vrot.slane %v689_v6, 4  ;;  %v549_v40 = vperm.slane %v548_v4, 0  ;;  %v1619_v0 = vld [vmem:[%s2307_s4 + $0x168] sm:$0xff]  ;;  %v1610_v2 = vld [vmem:[%s2307_s4 + $0x120] sm:$0xff] }
  0xfc   :  { %v560_v13 = vmul.f32 0.5, %v559_v54  ;;  %v2177_v14 = vsel %vm494_vm12, %v495_v5, %v493_v10  ;;  %1137 = vmatpush.bf16.msrb.mxu1 %v1582_v51  ;;  %1160 = vmatpush.bf16.msrb.mxu3 %v1601_v61  ;;  %v1618_v5 = vld [vmem:[%s2307_s4 + $0x160] sm:$0xff] }
  0xfd   :  { %v600_v55 = vrot.slane %v599_v7, 2  ;;  %v624_v15 = vrot.slane %v623_v8, 2  ;;  %v655_v16 = vsel %vm518_vm1, %v2177_v14, 0.0  ;;  %v691_v60 = vadd.f32 %v690_v12, %v689_v6  ;;  %1172 = vmatpush.bf16.msra.mxu0 %v1610_v2  ;;  %v1606_v61 = vld [vmem:[%s2307_s4 + $0x100] sm:$0xff] }
  0xfe   :  { %v550_v18 = vmul.f32 %v549_v40, %v1972_v59  ;;  %v2189_v19 = vsub.f32 %v2090_v9, %v560_v13  ;;  %v656_v11 = vrot.slane %v655_v16, 4  ;;  %1150 = vmatpush.bf16.msrb.mxu2 %v1590_v44  ;;  %v1599_v13 = vld [vmem:[%s2307_s4 + $0xc8] sm:$0xff] }
  0xff   :  { %v601_v21 = vadd.f32 %v600_v55, %v599_v7  ;;  %v625_v59 = vadd.f32 %v624_v15, %v623_v8  ;;  %v692_v22 = vrot.slane %v691_v60, 2 }
 0x100   :  { %v552_v25 = vadd.f32 %v551_v56, %v550_v18  ;;  %v562_v26 = vmul.f32 %v2189_v19, %v2189_v19  ;;  %v657_v27 = vadd.f32 %v656_v11, %v655_v16  ;;  %1182 = vmatpush.bf16.msra.mxu1 %v1621_v20  ;;  %v1617_v18 = vld [vmem:[%s2307_s4 + $0x158] sm:$0xff] }
 0x101   :  { %v602_v17 = vrot.slane %v601_v21, 1  ;;  %v626_v28 = vrot.slane %v625_v59, 1  ;;  %v693_v29 = vadd.f32 %v692_v22, %v691_v60  ;;  %v1598_v22 = vld [vmem:[%s2307_s4 + $0xc0] sm:$0xff] }
 0x102   :  { %v723_v31 = vpack.c.bf16 %v552_v25, %v552_v25  ;;  %v563_v9 = vsel %vm518_vm1, %v562_v26, 0.0  ;;  %v658_v33 = vrot.slane %v657_v27, 2  ;;  %v1608_v25 = vld [vmem:[%s2307_s4 + $0x110] sm:$0xff] }
 0x103   :  { %v603_v34 = vadd.f32 %v602_v17, %v601_v21  ;;  %v564_v36 = vrot.slane %v563_v9, 4  ;;  %v627_v23 = vadd.f32 %v626_v28, %v625_v59  ;;  %v694_v37 = vrot.slane %v693_v29, 1  ;;  %v1616_v17 = vld [vmem:[%s2307_s4 + $0x150] sm:$0xff] }
 0x104   :  { %1125 = vmatmul.bf16.vlgmr.msrb.gmra.mxu0 %v723_v31  ;;  %v659_v30 = vadd.f32 %v658_v33, %v657_v27  ;;  %1183 = vmatpush.bf16.msra.mxu1 %v1620_v41  ;;  %v1615_v41 = vld [vmem:[%s2307_s4 + $0x148] sm:$0xff] }
 0x105   :  { %v604_v42 = vmul.f32 0.5, %v603_v34  ;;  %v565_v45 = vadd.f32 %v564_v36, %v563_v9  ;;  %v628_v46 = vmul.f32 0.5, %v627_v23  ;;  %v695_v48 = vadd.f32 %v694_v37, %v693_v29 }
 0x106   :  { %v660_v32 = vrot.slane %v659_v30, 1 }
 0x107   :  { %v2206_v52 = vadd.f32 1e-05, %v604_v42  ;;  %v566_v49 = vrot.slane %v565_v45, 2  ;;  %v2215_v63 = vsub.f32 %v2138_v57, %v628_v46  ;;  %v696_v1 = vmul.f32 0.5, %v695_v48  ;;  %v1600_v57 = vld [vmem:[%s2307_s4 + $0xd0] sm:$0xff] }
 0x108   :  { %v661_v53 = vadd.f32 %v660_v32, %v659_v30  ;;  %1184 = vmatpush.bf16.msra.mxu1 %v1619_v0  ;;  %1161 = vmatpush.bf16.msrb.mxu3 %v1600_v57  ;;  %v1614_v0 = vld [vmem:[%s2307_s4 + $0x140] sm:$0xff] }
 0x109   :  { %1638 = vrsqrt.f32 %v2206_v52  ;;  %v567_v47 = vadd.f32 %v566_v49, %v565_v45  ;;  %v630_v3 = vmul.f32 %v2215_v63, %v2215_v63  ;;  %v2224_v39 = vsub.f32 %v2152_v35, %v696_v1 }
 0x10a   :  { %v662_v4 = vmul.f32 0.5, %v661_v53  ;;  %vm612_vm2 = vweird.f32 %v2206_v52 }
 0x10b   :  { %v568_v54 = vrot.slane %v567_v47, 1  ;;  %v631_v6 = vsel %vm518_vm1, %v630_v3, 0.0  ;;  %v698_v7 = vmul.f32 %v2224_v39, %v2224_v39 }
 0x10c   :  { %v2237_v35 = vsub.f32 %v2177_v14, %v662_v4  ;;  %v632_v10 = vrot.slane %v631_v6, 4  ;;  %v1609_v14 = vld [vmem:[%s2307_s4 + $0x118] sm:$0xff]  ;;  %1185 = vmatpush.bf16.msra.mxu1 %v1618_v5  ;;  %1162 = vmatpush.bf16.msrb.mxu3 %v1599_v13 }
 0x10d   :  { %v569_v8 = vadd.f32 %v568_v54, %v567_v47  ;;  %v699_v40 = vsel %vm518_vm1, %v698_v7, 0.0  ;;  %1173 = vmatpush.bf16.msra.mxu0 %v1609_v14  ;;  %v619_v47 = vperm.slane %v2157_v24, 2 }
 0x10e   :  { %v664_v12 = vmul.f32 %v2237_v35, %v2237_v35  ;;  %v633_v15 = vadd.f32 %v632_v10, %v631_v6  ;;  %v700_v16 = vrot.slane %v699_v40, 4 }
 0x10f   :  { %v1639_v56 = vpop.eup %1638  ;;  %v570_v55 = vmul.f32 0.5, %v569_v8 }
 0x110   :  { %v607_v60 = vmul.f32 %v1639_v56, %v2206_v52  ;;  %v665_v51 = vsel %vm518_vm1, %v664_v12, 0.0  ;;  %v634_v11 = vrot.slane %v633_v15, 2  ;;  %v701_v21 = vadd.f32 %v700_v16, %v699_v40  ;;  %1186 = vmatpush.bf16.msra.mxu1 %v1617_v18  ;;  %1163 = vmatpush.bf16.msrb.mxu3 %v1598_v22 }
 0x111   :  { %v2255_v44 = vadd.f32 1e-05, %v570_v55  ;;  %v666_v20 = vrot.slane %v665_v51, 4  ;;  %vm613_vm1 = vweird.f32 %v1639_v56  ;;  %1174 = vmatpush.bf16.msra.mxu0 %v1608_v25 }
 0x112   :  { %v608_v59 = vmul.f32 %v1639_v56, %v607_v60  ;;  %v635_v26 = vadd.f32 %v634_v11, %v633_v15  ;;  %v702_v29 = vrot.slane %v701_v21, 2  ;;  %vm614_vm3 = vmor %vm612_vm2, %vm613_vm1  ;;  %v585_v15 = vperm.slane %v2157_v24, 1 }
 0x113   :  { %1640 = vrsqrt.f32 %v2255_v44  ;;  %v667_v28 = vadd.f32 %v666_v20, %v665_v51  ;;  %vm578_vm5 = vweird.f32 %v2255_v44 }
 0x114   :  { %v609_v27 = vmul.f32 0.5, %v608_v59  ;;  %v636_v31 = vrot.slane %v635_v26, 1  ;;  %v703_v34 = vadd.f32 %v702_v29, %v701_v21  ;;  %1187 = vmatpush.bf16.msra.mxu1 %v1616_v17 }
 0x115   :  { %v668_v33 = vrot.slane %v667_v28, 2  ;;  %1175 = vmatpush.bf16.msra.mxu0 %v1607_v58 }
 0x116   :  { %v610_v9 = vsub.f32 1.5, %v609_v27  ;;  %v637_v36 = vadd.f32 %v636_v31, %v635_v26  ;;  %v704_v30 = vrot.slane %v703_v34, 1 }
 0x117   :  { %v669_v37 = vadd.f32 %v668_v33, %v667_v28  ;;  %v653_v33 = vperm.slane %v2157_v24, 3 }
 0x118   :  { %v611_v23 = vmul.f32 %v1639_v56, %v610_v9  ;;  %v638_v43 = vmul.f32 0.5, %v637_v36  ;;  %v705_v62 = vadd.f32 %v704_v30, %v703_v34  ;;  %1188 = vmatpush.bf16.msra.mxu1 %v1615_v41  ;;  %v721_v41 = vperm.slane %v2157_v24, 5 }
 0x119   :  { %v1641_v42 = vpop.eup %1640  ;;  %v670_v48 = vrot.slane %v669_v37, 1  ;;  %1176 = vmatpush.bf16.msra.mxu0 %v1606_v61 }
 0x11a   :  { %v615_v45 = vsel %vm614_vm3, %v1639_v56, %v611_v23  ;;  %v573_v46 = vmul.f32 %v1641_v42, %v2255_v44  ;;  %v639_v52 = vadd.f32 1e-05, %v638_v43  ;;  %v706_v3 = vmul.f32 0.5, %v705_v62 }
 0x11b   :  { %v616_v32 = vmul.f32 %v615_v45, %v2133_v50  ;;  %v671_v53 = vadd.f32 %v670_v48, %v669_v37  ;;  %vm579_vm4 = vweird.f32 %v1641_v42 }
 0x11c   :  { %v574_v49 = vmul.f32 %v1641_v42, %v573_v46  ;;  %1642 = vrsqrt.f32 %v639_v52  ;;  %v707_v54 = vadd.f32 1e-05, %v706_v3  ;;  %1189 = vmatpush.bf16.msra.mxu1 %v1614_v0  ;;  %vm580_vm6 = vmor %vm578_vm5, %vm579_vm4  ;;  %vm646_vm8 = vweird.f32 %v639_v52 }
 0x11d   :  { %v617_v1 = vperm.slane %v616_v32, 2  ;;  %v672_v57 = vmul.f32 0.5, %v671_v53  ;;  %v687_v46 = vperm.slane %v2157_v24, 4  ;;  %v1625_v24 = vld [vmem:[%s2308_s5] ss:$0 sm:$0xff] }
 0x11e   :  { %v575_v4 = vmul.f32 0.5, %v574_v49  ;;  %1644 = vrsqrt.f32 %v707_v54  ;;  %vm714_vm12 = vweird.f32 %v707_v54 }
 0x11f   :  { %v618_v2 = vmul.f32 %v617_v1, %v2112_v38  ;;  %v673_v6 = vadd.f32 1e-05, %v672_v57 }
 0x120   :  { %v576_v5 = vsub.f32 1.5, %v575_v4 }
 0x121   :  { %v620_v7 = vadd.f32 %v619_v47, %v618_v2  ;;  %1646 = vrsqrt.f32 %v673_v6  ;;  %vm680_vm13 = vweird.f32 %v673_v6 }
 0x122   :  { %v577_v8 = vmul.f32 %v1641_v42, %v576_v5  ;;  %v1643_v10 = vpop.eup %1642 }
 0x123   :  { %v725_v12 = vpack.c.bf16 %v620_v7, %v620_v7  ;;  %v641_v56 = vmul.f32 %v1643_v10, %v639_v52  ;;  %vm647_vm7 = vweird.f32 %v1643_v10 }
 0x124   :  { %v581_v40 = vsel %vm580_vm6, %v1641_v42, %v577_v8  ;;  %v1645_v14 = vpop.eup %1644  ;;  %vm648_vm9 = vmor %vm646_vm8, %vm647_vm7 }
 0x125   :  { %1151 = vmatmul.bf16.vlgmr.msrb.gmra.mxu2 %v725_v12  ;;  %v582_v38 = vmul.f32 %v581_v40, %v2133_v50  ;;  %v642_v13 = vmul.f32 %v1643_v10, %v641_v56  ;;  %v709_v18 = vmul.f32 %v1645_v14, %v707_v54  ;;  %vm715_vm10 = vweird.f32 %v1645_v14 }
 0x126   :  { %vm716_vm14 = vmor %vm714_vm12, %vm715_vm10 }
 0x127   :  { %v583_v55 = vperm.slane %v582_v38, 1  ;;  %v1647_v16 = vpop.eup %1646  ;;  %v643_v60 = vmul.f32 0.5, %v642_v13  ;;  %v710_v20 = vmul.f32 %v1645_v14, %v709_v18 }
 0x128   :  { %v675_v44 = vmul.f32 %v1647_v16, %v673_v6  ;;  %vm681_vm11 = vweird.f32 %v1647_v16 }
 0x129   :  { %v584_v51 = vmul.f32 %v583_v55, %v2189_v19  ;;  %v644_v11 = vsub.f32 1.5, %v643_v60  ;;  %v711_v25 = vmul.f32 0.5, %v710_v20  ;;  %vm682_vm15 = vmor %vm680_vm13, %vm681_vm11 }
 0x12a   :  { %v676_v59 = vmul.f32 %v1647_v16, %v675_v44 }
 0x12b   :  { %v586_v21 = vadd.f32 %v585_v15, %v584_v51  ;;  %v645_v22 = vmul.f32 %v1643_v10, %v644_v11  ;;  %v712_v28 = vsub.f32 1.5, %v711_v25 }
 0x12c   :  { %v677_v27 = vmul.f32 0.5, %v676_v59 }
 0x12d   :  { %v724_v26 = vpack.c.bf16 %v586_v21, %v586_v21  ;;  %v649_v17 = vsel %vm648_vm9, %v1643_v10, %v645_v22  ;;  %v713_v19 = vmul.f32 %v1645_v14, %v712_v28 }
 0x12e   :  { %v650_v29 = vmul.f32 %v649_v17, %v2133_v50  ;;  %v678_v31 = vsub.f32 1.5, %v677_v27 }
 0x12f   :  { %1138 = vmatmul.bf16.vlgmr.msrb.gmra.mxu1 %v724_v26  ;;  %v717_v36 = vsel %vm716_vm14, %v1645_v14, %v713_v19 }
 0x130   :  { %v651_v9 = vperm.slane %v650_v29, 3  ;;  %v679_v34 = vmul.f32 %v1647_v16, %v678_v31  ;;  %v718_v30 = vmul.f32 %v717_v36, %v2133_v50 }
 0x132   :  { %v652_v23 = vmul.f32 %v651_v9, %v2215_v63  ;;  %v683_v37 = vsel %vm682_vm15, %v1647_v16, %v679_v34  ;;  %v719_v58 = vperm.slane %v718_v30, 5 }
 0x133   :  { %v684_v42 = vmul.f32 %v683_v37, %v2133_v50 }
 0x134   :  { %v654_v43 = vadd.f32 %v653_v33, %v652_v23  ;;  %v720_v32 = vmul.f32 %v719_v58, %v2224_v39 }
 0x135   :  { %v685_v45 = vperm.slane %v684_v42, 4 }
 0x136   :  { %v726_v48 = vpack.c.bf16 %v654_v43, %v654_v43  ;;  %v722_v61 = vadd.f32 %v721_v41, %v720_v32 }
 0x137   :  { %v686_v52 = vmul.f32 %v685_v45, %v2237_v35 }
 0x138   :  { %1164 = vmatmul.bf16.vlgmr.msrb.gmra.mxu3 %v726_v48  ;;  %v728_v49 = vpack.c.bf16 %v722_v61, %v722_v61 }
 0x139   :  { %v688_v63 = vadd.f32 %v687_v46, %v686_v52 }
 0x13b   :  { %v727_v62 = vpack.c.bf16 %v688_v63, %v688_v63 }
 0x13d   :  { %1177 = vmatmul.bf16.vlgmr.msra.gmra.mxu0 %v727_v62 }
 0x13f   :  { %1190 = vmatmul.bf16.vlgmr.msra.gmra.mxu1 %v728_v49 }
 0x181   :  { %v1126_v50 = vpop.f32.mrf.mxu0 }
 0x182   :  { %v1127_v39 = vadd.f32 %v1625_v24, %v1126_v50 }
 0x189   :  { %v1128_v0 = vpop.f32.mrf.mxu0 }
 0x1a8   :  { %v1152_v53 = vpop.f32.mrf.mxu2 }
 0x1ac   :  { %v1139_v1 = vpop.f32.mrf.mxu1 }
 0x1ad   :  { %v1140_v4 = vadd.f32 %v1139_v1, %v1127_v39 }
 0x1af   :  { %v1153_v35 = vadd.f32 %v1152_v53, %v1140_v4 }
 0x1b0   :  { %v1154_v47 = vpop.f32.mrf.mxu2 }
 0x1b4   :  { %v1141_v3 = vpop.f32.mrf.mxu1 }
 0x1ba   :  { %v1178_v57 = vpop.f32.mrf.mxu0 }
 0x1bb   :  { %v1165_v2 = vpop.f32.mrf.mxu3 }
 0x1bc   :  { %v1191_v54 = vpop.f32.mrf.mxu1  ;;  %v1166_v5 = vadd.f32 %v1165_v2, %v1153_v35 }
 0x1be   :  { %v1179_v6 = vadd.f32 %v1178_v57, %v1166_v5 }
 0x1c0   :  { %v1192_v7 = vadd.f32 %v1191_v54, %v1179_v6 }
 0x1c2   :  { %1195 = vst [vmem:[#allocation2] sm:$0x3] %v1192_v7  ;;  %v1180_v8 = vpop.f32.mrf.mxu0 }
 0x1c3   :  { %v1167_v10 = vpop.f32.mrf.mxu3  ;;  %1206 = dma.vmem_to_hbm [thread:$0]  %s1202_s7, 32, %s1204_s10, [#allocation3]  }
 0x1c4   :  { %v1193_v12 = vpop.f32.mrf.mxu1 }
 0x1c5   :  { %1672 = dma.done.wait [#allocation3], 32  }
 0x1c6   :  { %1673 = vsyncadd [#allocation3], 4294967264 }
 0x1c7   :  { %1211 = vsyncpa [#allocation3], 1 }

</bundles_post_ra>
